<compile_context>
chip_gen: v7x
topology: tpu7x:2x2x1
jax: 0.10.0
libtpu: 0.0.40
codegen_flags: <defaults>
</compile_context>

<pallas_src>
import functools

import jax
import jax.numpy as jnp
from jax.experimental import pallas as pl
from jax.experimental.pallas import tpu as pltpu


def _round_up(x, m):
    return ((x + m - 1) // m) * m


_MAX_TILE_N = 1024   # node tile (sublane axis of the aggregation matmul)
_MAX_TILE_E = 512    # edge tile (reduction axis); multiples of 128 for lanes


# ---------------------------------------------------------------------------
# Pallas kernels
# ---------------------------------------------------------------------------

def spatial_graph_conv_kernel(rel_pos_ref, x_j_ref, dst_ref,
                              w_in_t_ref, b_in_ref, w_out_t_ref, b_out_ref,
                              out_ref, acc_ref):
    """One SpatialGraphConv layer, tiled over (node tiles, edge tiles).

    rel_pos_ref : [tE, coors]       pos_j - pos_i per edge (self loops incl.)
    x_j_ref     : [tE, C_in]        source-node features per edge
    dst_ref     : [1, tE]  int32    target node per edge (-1 for pad edges)
    w_in_t_ref  : [coors, C_in*H]   lin_in weight (transposed)
    b_in_ref    : [1, C_in*H]
    w_out_t_ref : [C_in*H, Cout_p]  lin_out weight (transposed, lane-padded)
    b_out_ref   : [1, Cout_p]
    out_ref     : [tN, Cout_p]
    acc_ref     : [tN, C_in*H]      f32 accumulator (persists over edge axis)
    """
    n = pl.program_id(0)
    e = pl.program_id(1)
    tile_n = out_ref.shape[0]
    tile_e, c_in = x_j_ref.shape
    coors = rel_pos_ref.shape[1]
    ch = b_in_ref.shape[1]
    hidden = ch // c_in

    @pl.when(e == 0)
    def _():
        acc_ref[...] = jnp.zeros_like(acc_ref)

    # message(): spatial_scaling = relu(lin_in(pos_j - pos_i))       [tE, C*H]
    # K = coors (2..3) is far too small for the MXU; do it as VPU FMAs.
    rel_pos = rel_pos_ref[...]
    w_in = w_in_t_ref[...]
    scaling = b_in_ref[...]                      # [1, C*H] -> broadcasts
    for c in range(coors):                       # static, unrolled
        scaling = scaling + rel_pos[:, c:c + 1] * w_in[c:c + 1, :]
    scaling = jnp.maximum(scaling, 0.0)

    # result = scaling.reshape(E, C, H) * x_j[:, :, None]  -> flat [tE, C*H]
    x_expand = jnp.repeat(x_j_ref[...], hidden, axis=1)     # [tE, C*H]
    msg = (scaling * x_expand).astype(jnp.bfloat16)

    # aggregate (aggr='add'): one-hot tile built on-chip from dst indices,
    # scatter-add as a bf16 MXU matmul accumulated in f32. Pad edges (dst=-1)
    # and out-of-tile nodes contribute exact zeros.
    row_ids = (jax.lax.broadcasted_iota(jnp.int32, (tile_n, tile_e), 0)
               + n * tile_n)
    a = (row_ids == dst_ref[...]).astype(jnp.bfloat16)       # [tN, tE]
    acc_ref[...] += jnp.dot(a, msg, preferred_element_type=jnp.float32)

    # update(): relu(lin_out(aggr)); dropout is identity at inference.
    @pl.when(e == pl.num_programs(1) - 1)
    def _():
        out = jnp.dot(acc_ref[...], w_out_t_ref[...],
                      preferred_element_type=jnp.float32) + b_out_ref[...]
        out_ref[...] = jnp.maximum(out, 0.0)


def fc_log_softmax_kernel(x_ref, w_t_ref, b_ref, out_ref, *, out_dim):
    """Final fc1 + log_softmax(dim=1); columns >= out_dim are lane padding."""
    logits = jnp.dot(x_ref[...], w_t_ref[...],
                     preferred_element_type=jnp.float32) + b_ref[...]
    col = jax.lax.broadcasted_iota(jnp.int32, logits.shape, 1)
    valid = col < out_dim
    logits = jnp.where(valid, logits, -1e30)
    m = jnp.max(logits, axis=1, keepdims=True)
    p = jnp.where(valid, jnp.exp(logits - m), 0.0)
    lse = jnp.log(jnp.sum(p, axis=1, keepdims=True)) + m
    out_ref[...] = logits - lse


# ---------------------------------------------------------------------------
# Wrappers (padding, tiling, params)
# ---------------------------------------------------------------------------

def spatial_graph_conv(x_j, rel_pos, dst_row, w_in, b_in, w_out, b_out,
                       *, num_nodes, hidden_size, tile_e):
    """x_j/rel_pos/dst_row are already edge-padded to a multiple of tile_e."""
    e_pad, in_channels = x_j.shape
    coors = rel_pos.shape[1]
    out_channels = w_out.shape[0]
    ch = in_channels * hidden_size

    # tiling: N ("parallel") x E ("arbitrary" reduction); lane-pad the output.
    tile_n = min(_MAX_TILE_N, _round_up(num_nodes, 8))
    n_pad = _round_up(num_nodes, tile_n)
    c_out_pad = _round_up(out_channels, 128)

    w_in_t = w_in.T                                           # [coors, C*H]
    b_in_2d = b_in.reshape(1, ch)
    w_out_t = jnp.pad(w_out.T, ((0, 0), (0, c_out_pad - out_channels)))
    b_out_2d = jnp.pad(b_out, (0, c_out_pad - out_channels)).reshape(1, c_out_pad)

    grid = (n_pad // tile_n, e_pad // tile_e)

    flops = (2 * n_pad * e_pad * ch            # aggregation matmul
             + 2 * n_pad * ch * c_out_pad      # lin_out
             + 3 * e_pad * ch * coors)         # lin_in FMAs
    bytes_accessed = 4 * (e_pad * (coors + in_channels + 1)
                          + n_pad * c_out_pad
                          + ch * (coors + c_out_pad + 2))

    out = pl.pallas_call(
        spatial_graph_conv_kernel,
        out_shape=jax.ShapeDtypeStruct((n_pad, c_out_pad), jnp.float32),
        grid_spec=pltpu.PrefetchScalarGridSpec(
            num_scalar_prefetch=0,
            grid=grid,
            in_specs=[
                pl.BlockSpec((tile_e, coors), lambda i, j: (j, 0)),
                pl.BlockSpec((tile_e, in_channels), lambda i, j: (j, 0)),
                pl.BlockSpec((1, tile_e), lambda i, j: (0, j)),
                pl.BlockSpec((coors, ch), lambda i, j: (0, 0)),
                pl.BlockSpec((1, ch), lambda i, j: (0, 0)),
                pl.BlockSpec((ch, c_out_pad), lambda i, j: (0, 0)),
                pl.BlockSpec((1, c_out_pad), lambda i, j: (0, 0)),
            ],
            out_specs=pl.BlockSpec((tile_n, c_out_pad), lambda i, j: (i, 0)),
            scratch_shapes=[pltpu.VMEM((tile_n, ch), jnp.float32)],
        ),
        compiler_params=pltpu.CompilerParams(
            dimension_semantics=("parallel", "arbitrary"),
            vmem_limit_bytes=32 * 1024 * 1024),
        cost_estimate=pl.CostEstimate(flops=flops, transcendentals=0,
                                      bytes_accessed=bytes_accessed),
    )(rel_pos, x_j, dst_row, w_in_t, b_in_2d, w_out_t, b_out_2d)

    return out[:num_nodes, :out_channels]


def fc_log_softmax(x, w, b):
    num_nodes, in_dim = x.shape
    out_dim = w.shape[0]
    out_pad = _round_up(out_dim, 128)
    tile_n = min(_MAX_TILE_N, _round_up(num_nodes, 8))
    n_pad = _round_up(num_nodes, tile_n)

    x_p = jnp.pad(x, ((0, n_pad - num_nodes), (0, 0)))
    w_t = jnp.pad(w.T, ((0, 0), (0, out_pad - out_dim)))
    b_2d = jnp.pad(b, (0, out_pad - out_dim)).reshape(1, out_pad)

    kernel = functools.partial(fc_log_softmax_kernel, out_dim=out_dim)
    out = pl.pallas_call(
        kernel,
        out_shape=jax.ShapeDtypeStruct((n_pad, out_pad), jnp.float32),
        grid_spec=pltpu.PrefetchScalarGridSpec(
            num_scalar_prefetch=0,
            grid=(n_pad // tile_n,),
            in_specs=[
                pl.BlockSpec((tile_n, in_dim), lambda i: (i, 0)),
                pl.BlockSpec((in_dim, out_pad), lambda i: (0, 0)),
                pl.BlockSpec((1, out_pad), lambda i: (0, 0)),
            ],
            out_specs=pl.BlockSpec((tile_n, out_pad), lambda i: (i, 0)),
        ),
        compiler_params=pltpu.CompilerParams(
            dimension_semantics=("parallel",),
            vmem_limit_bytes=32 * 1024 * 1024),
    )(x_p, w_t, b_2d)
    return out[:num_nodes, :out_dim]


def init_linear(key, in_dim, out_dim):
    """Deterministic torch.nn.Linear-style init (uniform +-1/sqrt(in))."""
    k1, k2 = jax.random.split(key)
    bound = 1.0 / (in_dim ** 0.5)
    w = jax.random.uniform(k1, (out_dim, in_dim), jnp.float32, -bound, bound)
    b = jax.random.uniform(k2, (out_dim,), jnp.float32, -bound, bound)
    return w, b


def init_sgcn_params(key, *, dim_coor, out_dim, input_features, layers_num,
                     model_dim, out_channels_1):
    params = {"layers": []}
    for i in range(layers_num):
        in_ch = input_features if i == 0 else model_dim
        key, k1, k2 = jax.random.split(key, 3)
        w_in, b_in = init_linear(k1, dim_coor, out_channels_1 * in_ch)
        w_out, b_out = init_linear(k2, out_channels_1 * in_ch, model_dim)
        params["layers"].append(
            dict(w_in=w_in, b_in=b_in, w_out=w_out, b_out=b_out))
    key, kf = jax.random.split(key)
    params["fc1"] = init_linear(kf, model_dim, out_dim)
    params["hidden"] = out_channels_1
    return params


def sgcn_forward(params, x, pos, edge_index, *, use_cluster_pooling=False):
    num_nodes = x.shape[0]
    # add_self_loops
    loop = jnp.arange(num_nodes, dtype=edge_index.dtype)
    src = jnp.concatenate([edge_index[0], loop])   # j (source)
    dst = jnp.concatenate([edge_index[1], loop])   # i (target, aggregation)
    e_total = src.shape[0]

    # Edge-major gathers / padding hoisted out of the layer loop: pos (hence
    # rel_pos and dst) is constant across layers in the non-pooling path.
    # Pad edges gather src=0 but carry dst=-1 so the on-chip one-hot zeroes
    # their contribution exactly.
    tile_e = min(_MAX_TILE_E, _round_up(e_total, 128))
    e_pad = _round_up(e_total, tile_e)
    rel_pos = jnp.pad(pos[src] - pos[dst],          # pos_j - pos_i
                      ((0, e_pad - e_total), (0, 0)))
    src_p = jnp.pad(src, (0, e_pad - e_total))
    dst_row = jnp.pad(dst.astype(jnp.int32), (0, e_pad - e_total),
                      constant_values=-1).reshape(1, e_pad)

    for layer in params["layers"]:
        x_j = x[src_p]                              # [e_pad, C_in]
        x = spatial_graph_conv(x_j, rel_pos, dst_row,
                               layer["w_in"], layer["b_in"],
                               layer["w_out"], layer["b_out"],
                               num_nodes=num_nodes,
                               hidden_size=params["hidden"],
                               tile_e=tile_e)
        if use_cluster_pooling:
            # TODO(synk): graclus clustering + max_pool have no clean Pallas
            # equivalent; only the non-pooling path is implemented.
            raise NotImplementedError("use_cluster_pooling not supported")

    w_fc, b_fc = params["fc1"]
    return fc_log_softmax(x, w_fc, b_fc)


# ---------------------------------------------------------------------------
# Demo
# ---------------------------------------------------------------------------

if __name__ == "__main__":
    key = jax.random.PRNGKey(0)

    # small hyper-params consistent with the module
    dim_coor = 2
    out_dim = 4
    input_features = 4
    layers_num = 2
    model_dim = 8
    out_channels_1 = 16   # hidden_size
    num_nodes = 16
    num_edges = 32

    key, kx, kp, ke, kparam = jax.random.split(key, 5)
    x = jax.random.normal(kx, (num_nodes, input_features), jnp.float32)
    pos = jax.random.normal(kp, (num_nodes, dim_coor), jnp.float32)
    edge_index = jax.random.randint(ke, (2, num_edges), 0, num_nodes,
                                    dtype=jnp.int32)

    params = init_sgcn_params(kparam,
                              dim_coor=dim_coor, out_dim=out_dim,
                              input_features=input_features,
                              layers_num=layers_num, model_dim=model_dim,
                              out_channels_1=out_channels_1)

    out = sgcn_forward(params, x, pos, edge_index, use_cluster_pooling=False)
    out = jax.block_until_ready(out)
    assert out.shape == (num_nodes, out_dim)
    # rows of log_softmax should exp-sum to ~1
    assert jnp.allclose(jnp.sum(jnp.exp(out), axis=1), 1.0, atol=1e-3)
    print("KERNEL_OK")
</pallas_src>

<mosaic_0001>
module attributes {stable_mosaic.version = 11 : i64} {
  func.func @spatial_graph_conv_kernel(%arg0: i32, %arg1: i32, %arg2: memref<128x2xf32, #tpu.memory_space<vmem>>, %arg3: memref<128x4xf32, #tpu.memory_space<vmem>>, %arg4: memref<1x128xi32, #tpu.memory_space<vmem>>, %arg5: memref<2x64xf32, #tpu.memory_space<vmem>>, %arg6: memref<1x64xf32, #tpu.memory_space<vmem>>, %arg7: memref<64x128xf32, #tpu.memory_space<vmem>>, %arg8: memref<1x128xf32, #tpu.memory_space<vmem>>, %arg9: memref<16x128xf32, #tpu.memory_space<vmem>>, %arg10: memref<16x64xf32, #tpu.memory_space<vmem>>) attributes {dimension_semantics = [#tpu.dimension_semantics<parallel>, #tpu.dimension_semantics<arbitrary>], iteration_bounds = array<i64: 1, 1>, scalar_prefetch = 0 : i64, scratch_operands = 1 : i64, tpu.core_type = #tpu.core_type<tc>, window_params = [{transform_indices = @transform_0, window_bounds = array<i64: 128, 2>}, {transform_indices = @transform_1, window_bounds = array<i64: 128, 4>}, {transform_indices = @transform_2, window_bounds = array<i64: 1, 128>}, {pipeline_mode = #tpu.pipeline_mode<synchronous>, transform_indices = @transform_3, window_bounds = array<i64: 2, 64>}, {pipeline_mode = #tpu.pipeline_mode<synchronous>, transform_indices = @transform_4, window_bounds = array<i64: 1, 64>}, {pipeline_mode = #tpu.pipeline_mode<synchronous>, transform_indices = @transform_5, window_bounds = array<i64: 64, 128>}, {pipeline_mode = #tpu.pipeline_mode<synchronous>, transform_indices = @transform_6, window_bounds = array<i64: 1, 128>}, {transform_indices = @transform_7, window_bounds = array<i64: 16, 128>}]} {
    %c0_i32 = arith.constant 0 : i32
    %0 = arith.cmpi eq, %arg1, %c0_i32 : i32
    %1 = arith.extui %0 : i1 to i32
    %c0_i32_0 = arith.constant 0 : i32
    %2 = arith.cmpi ne, %1, %c0_i32_0 : i32
    scf.if %2 {
      %cst_17 = arith.constant 0.000000e+00 : f32
      %44 = vector.broadcast %cst_17 : f32 to vector<16x64xf32>
      %c0_18 = arith.constant 0 : index
      %c0_19 = arith.constant 0 : index
      %45 = vector.load %arg10[%c0_18, %c0_19] : memref<16x64xf32, #tpu.memory_space<vmem>>, vector<16x64xf32>
      tpu.vector_store %arg10[%c0_18, %c0_19], %44 {strides = array<i32>} : memref<16x64xf32, #tpu.memory_space<vmem>>, vector<16x64xf32>,
    } else {
    }
    %c0 = arith.constant 0 : index
    %c0_1 = arith.constant 0 : index
    %3 = vector.load %arg2[%c0, %c0_1] : memref<128x2xf32, #tpu.memory_space<vmem>>, vector<128x2xf32>
    %c0_2 = arith.constant 0 : index
    %c0_3 = arith.constant 0 : index
    %4 = vector.load %arg5[%c0_2, %c0_3] : memref<2x64xf32, #tpu.memory_space<vmem>>, vector<2x64xf32>
    %c0_4 = arith.constant 0 : index
    %c0_5 = arith.constant 0 : index
    %5 = vector.load %arg6[%c0_4, %c0_5] : memref<1x64xf32, #tpu.memory_space<vmem>>, vector<1x64xf32>
    %6 = vector.extract_strided_slice %3 {offsets = [0, 0], sizes = [128, 1], strides = [1, 1]} : vector<128x2xf32> to vector<128x1xf32>
    %7 = vector.extract_strided_slice %4 {offsets = [0, 0], sizes = [1, 64], strides = [1, 1]} : vector<2x64xf32> to vector<1x64xf32>
    %8 = vector.broadcast %6 : vector<128x1xf32> to vector<128x64xf32>
    %9 = vector.broadcast %7 : vector<1x64xf32> to vector<128x64xf32>
    %10 = arith.mulf %8, %9 : vector<128x64xf32>
    %11 = vector.broadcast %5 : vector<1x64xf32> to vector<128x64xf32>
    %12 = arith.addf %11, %10 : vector<128x64xf32>
    %13 = vector.extract_strided_slice %3 {offsets = [0, 1], sizes = [128, 1], strides = [1, 1]} : vector<128x2xf32> to vector<128x1xf32>
    %14 = vector.extract_strided_slice %4 {offsets = [1, 0], sizes = [1, 64], strides = [1, 1]} : vector<2x64xf32> to vector<1x64xf32>
    %15 = vector.broadcast %13 : vector<128x1xf32> to vector<128x64xf32>
    %16 = vector.broadcast %14 : vector<1x64xf32> to vector<128x64xf32>
    %17 = arith.mulf %15, %16 : vector<128x64xf32>
    %18 = arith.addf %12, %17 : vector<128x64xf32>
    %cst = arith.constant 0.000000e+00 : f32
    %19 = vector.broadcast %cst : f32 to vector<128x64xf32>
    %20 = arith.maximumf %18, %19 : vector<128x64xf32>
    %c0_6 = arith.constant 0 : index
    %c0_7 = arith.constant 0 : index
    %21 = vector.load %arg3[%c0_6, %c0_7] : memref<128x4xf32, #tpu.memory_space<vmem>>, vector<128x4xf32>
    %22 = vector.shape_cast %21 : vector<128x4xf32> to vector<128x4x1xf32>
    %23 = vector.broadcast %22 : vector<128x4x1xf32> to vector<128x4x16xf32>
    %24 = vector.shape_cast %23 : vector<128x4x16xf32> to vector<128x64xf32>
    %25 = arith.mulf %20, %24 : vector<128x64xf32>
    %26 = arith.truncf %25 : vector<128x64xf32> to vector<128x64xbf16>
    %27 = tpu.iota {dimensions = array<i32: 0>} : vector<16x128xi32>
    %c16_i32 = arith.constant 16 : i32
    %28 = arith.muli %arg0, %c16_i32 : i32
    %29 = vector.broadcast %28 : i32 to vector<16x128xi32>
    %30 = arith.addi %27, %29 : vector<16x128xi32>
    %c0_8 = arith.constant 0 : index
    %c0_9 = arith.constant 0 : index
    %31 = vector.load %arg4[%c0_8, %c0_9] : memref<1x128xi32, #tpu.memory_space<vmem>>, vector<1x128xi32>
    %32 = vector.broadcast %31 : vector<1x128xi32> to vector<16x128xi32>
    %33 = arith.cmpi eq, %30, %32 : vector<16x128xi32>
    %34 = arith.extui %33 : vector<16x128xi1> to vector<16x128xi32>
    %35 = arith.sitofp %34 : vector<16x128xi32> to vector<16x128xf32>
    %36 = arith.truncf %35 : vector<16x128xf32> to vector<16x128xbf16>
    %c0_10 = arith.constant 0 : index
    %c0_11 = arith.constant 0 : index
    %37 = vector.load %arg10[%c0_10, %c0_11] : memref<16x64xf32, #tpu.memory_space<vmem>>, vector<16x64xf32>
    %cst_12 = arith.constant dense<0.000000e+00> : vector<16x64xf32>
    %38 = tpu.matmul %36, %26, %cst_12 {dimension_numbers = #tpu.dot_dimension_numbers<[1], [0], [0], [1], [0, 0, 1, 1], [], []>} : vector<16x128xbf16>, vector<128x64xbf16>, vector<16x64xf32> -> vector<16x64xf32>
    %39 = arith.addf %37, %38 : vector<16x64xf32>
    %c0_13 = arith.constant 0 : index
    %c0_14 = arith.constant 0 : index
    %40 = vector.load %arg10[%c0_13, %c0_14] : memref<16x64xf32, #tpu.memory_space<vmem>>, vector<16x64xf32>
    tpu.vector_store %arg10[%c0_13, %c0_14], %39 {strides = array<i32>} : memref<16x64xf32, #tpu.memory_space<vmem>>, vector<16x64xf32>,
    %c0_i32_15 = arith.constant 0 : i32
    %41 = arith.cmpi eq, %arg1, %c0_i32_15 : i32
    %42 = arith.extui %41 : i1 to i32
    %c0_i32_16 = arith.constant 0 : i32
    %43 = arith.cmpi ne, %42, %c0_i32_16 : i32
    scf.if %43 {
      %c0_17 = arith.constant 0 : index
      %c0_18 = arith.constant 0 : index
      %44 = vector.load %arg10[%c0_17, %c0_18] : memref<16x64xf32, #tpu.memory_space<vmem>>, vector<16x64xf32>
      %c0_19 = arith.constant 0 : index
      %c0_20 = arith.constant 0 : index
      %45 = vector.load %arg7[%c0_19, %c0_20] : memref<64x128xf32, #tpu.memory_space<vmem>>, vector<64x128xf32>
      %cst_21 = arith.constant dense<0.000000e+00> : vector<16x128xf32>
      %46 = tpu.matmul %44, %45, %cst_21 {dimension_numbers = #tpu.dot_dimension_numbers<[1], [0], [0], [1], [0, 0, 1, 1], [], []>} : vector<16x64xf32>, vector<64x128xf32>, vector<16x128xf32> -> vector<16x128xf32>
      %c0_22 = arith.constant 0 : index
      %c0_23 = arith.constant 0 : index
      %47 = vector.load %arg8[%c0_22, %c0_23] : memref<1x128xf32, #tpu.memory_space<vmem>>, vector<1x128xf32>
      %48 = vector.broadcast %47 : vector<1x128xf32> to vector<16x128xf32>
      %49 = arith.addf %46, %48 : vector<16x128xf32>
      %cst_24 = arith.constant 0.000000e+00 : f32
      %50 = vector.broadcast %cst_24 : f32 to vector<16x128xf32>
      %51 = arith.maximumf %49, %50 : vector<16x128xf32>
      %c0_25 = arith.constant 0 : index
      %c0_26 = arith.constant 0 : index
      %52 = vector.load %arg9[%c0_25, %c0_26] : memref<16x128xf32, #tpu.memory_space<vmem>>, vector<16x128xf32>
      tpu.vector_store %arg9[%c0_25, %c0_26], %51 {strides = array<i32>} : memref<16x128xf32, #tpu.memory_space<vmem>>, vector<16x128xf32>,
    } else {
    }
    return
  }
  func.func @transform_0(%arg0: i32, %arg1: i32) -> (i32, i32) {
    %c0_i32 = arith.constant 0 : i32
    %c0_i32_0 = arith.constant 0 : i32
    return %arg1, %c0_i32 : i32, i32
  }
  func.func @transform_1(%arg0: i32, %arg1: i32) -> (i32, i32) {
    %c0_i32 = arith.constant 0 : i32
    %c0_i32_0 = arith.constant 0 : i32
    return %arg1, %c0_i32 : i32, i32
  }
  func.func @transform_2(%arg0: i32, %arg1: i32) -> (i32, i32) {
    %c0_i32 = arith.constant 0 : i32
    %c0_i32_0 = arith.constant 0 : i32
    return %c0_i32, %arg1 : i32, i32
  }
  func.func @transform_3(%arg0: i32, %arg1: i32) -> (i32, i32) {
    %c0_i32 = arith.constant 0 : i32
    %c0_i32_0 = arith.constant 0 : i32
    %c0_i32_1 = arith.constant 0 : i32
    return %c0_i32, %c0_i32_0 : i32, i32
  }
  func.func @transform_4(%arg0: i32, %arg1: i32) -> (i32, i32) {
    %c0_i32 = arith.constant 0 : i32
    %c0_i32_0 = arith.constant 0 : i32
    %c0_i32_1 = arith.constant 0 : i32
    return %c0_i32, %c0_i32_0 : i32, i32
  }
  func.func @transform_5(%arg0: i32, %arg1: i32) -> (i32, i32) {
    %c0_i32 = arith.constant 0 : i32
    %c0_i32_0 = arith.constant 0 : i32
    %c0_i32_1 = arith.constant 0 : i32
    return %c0_i32, %c0_i32_0 : i32, i32
  }
  func.func @transform_6(%arg0: i32, %arg1: i32) -> (i32, i32) {
    %c0_i32 = arith.constant 0 : i32
    %c0_i32_0 = arith.constant 0 : i32
    %c0_i32_1 = arith.constant 0 : i32
    return %c0_i32, %c0_i32_0 : i32, i32
  }
  func.func @transform_7(%arg0: i32, %arg1: i32) -> (i32, i32) {
    %c0_i32 = arith.constant 0 : i32
    %c0_i32_0 = arith.constant 0 : i32
    return %arg0, %c0_i32 : i32, i32
  }
}

</mosaic_0001>

<bundles_post_ra>
// kernel: tpu_custom_call.1
= control target key start
LH: loop header
LB: loop body
LE: loop exit
PB: predicated region body
PF: predicated region fallthrough
CT: control target
= control target key end

     0   :  { %v133_v0 = vlaneseq  ;;  %s4152_s0 = inlined_call_operand.vmem [shape: f32[128,2], index: 0, kind: input, shape index: {}]   ;;  %s4153_s1 = inlined_call_operand.vmem [shape: f32[128,4], index: 1, kind: input, shape index: {}]   ;;  %s4154_s2 = inlined_call_operand.vmem [shape: s32[1,128], index: 2, kind: input, shape index: {}]   ;;  %s4155_s3 = inlined_call_operand.vmem [shape: f32[2,64], index: 3, kind: input, shape index: {}]   ;;  %s4156_s4 = inlined_call_operand.vmem [shape: f32[1,64], index: 4, kind: input, shape index: {}]   ;;  %s4157_s5 = inlined_call_operand.vmem [shape: f32[64,128], index: 5, kind: input, shape index: {}]   ;;  %s4158_s6 = inlined_call_operand.vmem [shape: f32[1,128], index: 6, kind: input, shape index: {}]   ;;  %s4159_s7 = inlined_call_operand.hbm [shape: f32[16,128], index: 7, kind: output, shape index: {}]  }
   0x1   :  { %v291_v2 = vld [vmem:[%s4153_s1] sm:$0xff] }
   0x2   :  { %v2937_v1 = vshrl.u32 %v133_v0, 7 }
   0x4   :  { %4195 = vst [vmem:[#allocation6_spill] sm:$0xff] %v2937_v1 }
   0x5   :  { %12 = vsyncpa [#allocation4], 0  ;;  %v2943_v3 = vsub.s32 2, %v2937_v1  ;;  %v2946_v4 = vsub.s32 0, %v2937_v1  ;;  %v2949_v5 = vsub.s32 3, %v2937_v1  ;;  %v2952_v6 = vsub.s32 1, %v2937_v1 }
   0x6   :  { %v2959_v11 = vsub.s32 5, %v2937_v1  ;;  %v2962_v12 = vsub.s32 4, %v2937_v1  ;;  %v2967_v15 = vsub.s32 7, %v2937_v1  ;;  %v2970_v16 = vsub.s32 6, %v2937_v1  ;;  %v292_v19 = vld [vmem:[%s4153_s1 + $0x8] sm:$0xff]  ;;  %v293_v28 = vld [vmem:[%s4153_s1 + $0x10] sm:$0xff] }
   0x7   :  { %4196 = vst [vmem:[#allocation7_spill] sm:$0xff] %v2946_v4  ;;  %4197 = vst [vmem:[#allocation8_spill] sm:$0xff] %v2952_v6  ;;  %v324_v7 = vrot.slane %v291_v2, %v2943_v3  ;;  %v310_v8 = vrot.slane %v291_v2, %v2946_v4  ;;  %v331_v9 = vrot.slane %v291_v2, %v2949_v5  ;;  %v294_v37 = vld [vmem:[%s4153_s1 + $0x18] sm:$0xff]  ;;  %v295_v46 = vld [vmem:[%s4153_s1 + $0x20] sm:$0xff]  ;;  %s2888_s17 = smov 16   ;;  %s2889_s20 = smov 32  }
   0x8   :  { %v317_v10 = vrot.slane %v291_v2, %v2952_v6  ;;  %v345_v13 = vrot.slane %v291_v2, %v2959_v11  ;;  %v338_v14 = vrot.slane %v291_v2, %v2962_v12  ;;  %v359_v17 = vrot.slane %v291_v2, %v2967_v15  ;;  %v296_v55 = vld [vmem:[%s4153_s1 + $0x28] sm:$0xff]  ;;  %v297_v0 = vld [vmem:[%s4153_s1 + $0x30] sm:$0xff]  ;;  %s2890_s21 = smov 48   ;;  %s2894_s15 = smov [#allocation3]  }
   0x9   :  { %326 = vbcast.lane.b32.xlu1 %v324_v7, 256  ;;  %312 = vbcast.lane.b32.xlu0 %v310_v8, 256  ;;  %v352_v18 = vrot.slane %v291_v2, %v2970_v16  ;;  %v373_v20 = vrot.slane %v292_v19, %v2952_v6  ;;  %v366_v21 = vrot.slane %v292_v19, %v2946_v4  ;;  %vm2483_vm0 = vcmask 130048   ;;  %s2735_s16 = sshll.u32 %s2894_s15, 4  ;;  %s2736_s16 = int_to_ptr.vmem [resolvable:$true] %s2735_s16 }
   0xa   :  { %v387_v22 = vrot.slane %v292_v19, %v2949_v5  ;;  %v380_v23 = vrot.slane %v292_v19, %v2943_v3  ;;  %v401_v24 = vrot.slane %v292_v19, %v2959_v11  ;;  %v394_v25 = vrot.slane %v292_v19, %v2962_v12  ;;  %s2860_s18 = scalar_lea.vmem %s2736_s16, 256  ;;  %p2865_p1 = scmp.lt.s32.totalorder %s2736_s16, %s2736_s16 }
   0xb   :  { %v415_v26 = vrot.slane %v292_v19, %v2967_v15  ;;  %v408_v27 = vrot.slane %v292_v19, %v2970_v16  ;;  %v429_v29 = vrot.slane %v293_v28, %v2952_v6  ;;  %v422_v30 = vrot.slane %v293_v28, %v2946_v4  ;;  %p2861_p0 = scmp.ne.s32.totalorder %s2736_s16, %s2860_s18  ;;  %p2866_p2 = scmp.lt.s32.totalorder %s2860_s18, %s2860_s18 }
   0xc   :  { %v443_v31 = vrot.slane %v293_v28, %v2949_v5  ;;  %v436_v32 = vrot.slane %v293_v28, %v2943_v3  ;;  %v457_v33 = vrot.slane %v293_v28, %v2959_v11  ;;  %v450_v34 = vrot.slane %v293_v28, %v2962_v12 }
   0xd   :  { %333 = vbcast.lane.b32.xlu1 %v331_v9, 256  ;;  %319 = vbcast.lane.b32.xlu0 %v317_v10, 256  ;;  %v471_v35 = vrot.slane %v293_v28, %v2967_v15  ;;  %v464_v36 = vrot.slane %v293_v28, %v2970_v16  ;;  %v485_v38 = vrot.slane %v294_v37, %v2952_v6  ;;  %vm2500_vm1 = vcmask 261120   ;;  %p2867_p3 = por %p2866_p2, %p2865_p1 }
   0xe   :  { %v478_v39 = vrot.slane %v294_v37, %v2946_v4  ;;  %v499_v40 = vrot.slane %v294_v37, %v2949_v5  ;;  %v492_v41 = vrot.slane %v294_v37, %v2943_v3  ;;  %v513_v42 = vrot.slane %v294_v37, %v2959_v11 }
   0xf   :  { %v506_v43 = vrot.slane %v294_v37, %v2962_v12  ;;  %v527_v44 = vrot.slane %v294_v37, %v2967_v15  ;;  %v520_v45 = vrot.slane %v294_v37, %v2970_v16  ;;  %v541_v47 = vrot.slane %v295_v46, %v2952_v6  ;;  %p2868_p4 = pnand %p2867_p3, %p2861_p0 }
  0x10   :  { %v534_v48 = vrot.slane %v295_v46, %v2946_v4  ;;  %v555_v49 = vrot.slane %v295_v46, %v2949_v5  ;;  %v548_v50 = vrot.slane %v295_v46, %v2943_v3  ;;  %v569_v51 = vrot.slane %v295_v46, %v2959_v11 }
  0x11   :  { %347 = vbcast.lane.b32.xlu1 %v345_v13, 256  ;;  %340 = vbcast.lane.b32.xlu0 %v338_v14, 256  ;;  %v562_v52 = vrot.slane %v295_v46, %v2962_v12  ;;  %v583_v53 = vrot.slane %v295_v46, %v2967_v15  ;;  %v576_v54 = vrot.slane %v295_v46, %v2970_v16  ;;  %vm2517_vm2 = vcmask 392192  }
  0x12   :  { %v597_v56 = vrot.slane %v296_v55, %v2952_v6  ;;  %v590_v57 = vrot.slane %v296_v55, %v2946_v4  ;;  %v611_v58 = vrot.slane %v296_v55, %v2949_v5  ;;  %v604_v59 = vrot.slane %v296_v55, %v2943_v3 }
  0x13   :  { %v625_v60 = vrot.slane %v296_v55, %v2959_v11  ;;  %v618_v61 = vrot.slane %v296_v55, %v2962_v12  ;;  %v639_v62 = vrot.slane %v296_v55, %v2967_v15  ;;  %v632_v63 = vrot.slane %v296_v55, %v2970_v16 }
  0x14   :  { %v653_v2 = vrot.slane %v297_v0, %v2952_v6  ;;  %v646_v7 = vrot.slane %v297_v0, %v2946_v4  ;;  %v667_v8 = vrot.slane %v297_v0, %v2949_v5  ;;  %v660_v9 = vrot.slane %v297_v0, %v2943_v3 }
  0x15   :  { %361 = vbcast.lane.b32.xlu1 %v359_v17, 256  ;;  %354 = vbcast.lane.b32.xlu0 %v352_v18, 256  ;;  %v681_v10 = vrot.slane %v297_v0, %v2959_v11  ;;  %v674_v13 = vrot.slane %v297_v0, %v2962_v12  ;;  %v695_v14 = vrot.slane %v297_v0, %v2967_v15  ;;  %v298_v18 = vld [vmem:[%s4153_s1 + $0x38] sm:$0xff]  ;;  %vm2892_vm3 = vmmov 0  }
  0x16   :  { %v688_v17 = vrot.slane %v297_v0, %v2970_v16  ;;  %v709_v19 = vrot.slane %v298_v18, %v2952_v6  ;;  %v730_v28 = vrot.slane %v298_v18, %v2962_v12  ;;  %vm32_vm4 = vcmask 523264  }
  0x19   :  { %375 = vbcast.lane.b32.xlu1 %v373_v20, 256  ;;  %368 = vbcast.lane.b32.xlu0 %v366_v21, 256  ;;  %v702_v20 = vrot.slane %v298_v18, %v2946_v4  ;;  %v723_v21 = vrot.slane %v298_v18, %v2949_v5 }
  0x1d   :  { %389 = vbcast.lane.b32.xlu1 %v387_v22, 256  ;;  %382 = vbcast.lane.b32.xlu0 %v380_v23, 256  ;;  %v716_v22 = vrot.slane %v298_v18, %v2943_v3 }
  0x21   :  { %403 = vbcast.lane.b32.xlu1 %v401_v24, 256  ;;  %396 = vbcast.lane.b32.xlu0 %v394_v25, 256  ;;  %v2884_v25 = vmov 1983009808  }
  0x25   :  { %417 = vbcast.lane.b32.xlu1 %v415_v26, 256  ;;  %410 = vbcast.lane.b32.xlu0 %v408_v27, 256  ;;  %v1205_v26 = vunpack.c.l.s4 %v2884_v25  ;;  %v737_v27 = vrot.slane %v298_v18, %v2959_v11 }
  0x29   :  { %431 = vbcast.lane.b32.xlu1 %v429_v29, 256  ;;  %424 = vbcast.lane.b32.xlu0 %v422_v30, 256 }
  0x2d   :  { %445 = vbcast.lane.b32.xlu1 %v443_v31, 256  ;;  %438 = vbcast.lane.b32.xlu0 %v436_v32, 256  ;;  %v1206_v31 = vunpack.c.0.s8 %v1205_v26  ;;  %v751_v32 = vrot.slane %v298_v18, %v2967_v15 }
  0x31   :  { %459 = vbcast.lane.b32.xlu1 %v457_v33, 256  ;;  %452 = vbcast.lane.b32.xlu0 %v450_v34, 256  ;;  %v744_v33 = vrot.slane %v298_v18, %v2970_v16  ;;  %v299_v34 = vld [vmem:[%s4153_s1 + $0x40] sm:$0xff] }
  0x35   :  { %473 = vbcast.lane.b32.xlu1 %v471_v35, 256  ;;  %466 = vbcast.lane.b32.xlu0 %v464_v36, 256  ;;  %v2885_v35 = vmov 1934713408  }
  0x36   :  { %v1238_v36 = vunpack.c.l.s4 %v2885_v35 }
  0x39   :  { %487 = vbcast.lane.b32.xlu1 %v485_v38, 256  ;;  %480 = vbcast.lane.b32.xlu0 %v478_v39, 256 }
  0x3d   :  { %501 = vbcast.lane.b32.xlu1 %v499_v40, 256  ;;  %494 = vbcast.lane.b32.xlu0 %v492_v41, 256  ;;  %v3055_v40 = vsub.s32 %v1206_v31, %v2937_v1 }
  0x41   :  { %515 = vbcast.lane.b32.xlu1 %v513_v42, 256  ;;  %508 = vbcast.lane.b32.xlu0 %v506_v43, 256  ;;  %v765_v42 = vrot.slane %v299_v34, %v2952_v6  ;;  %v758_v43 = vrot.slane %v299_v34, %v2946_v4 }
  0x45   :  { %529 = vbcast.lane.b32.xlu1 %v527_v44, 256  ;;  %522 = vbcast.lane.b32.xlu0 %v520_v45, 256  ;;  %v1239_v44 = vunpack.c.0.s8 %v1238_v36 }
  0x49   :  { %543 = vbcast.lane.b32.xlu1 %v541_v47, 256  ;;  %536 = vbcast.lane.b32.xlu0 %v534_v48, 256 }
  0x4d   :  { %557 = vbcast.lane.b32.xlu1 %v555_v49, 256  ;;  %550 = vbcast.lane.b32.xlu0 %v548_v50, 256  ;;  %v4160_v50 = vmov 0  }
  0x4e   :  { %2843 = vset.pattern.permute.xlu1 %v4160_v50  ;;  %2842 = vset.pattern.permute.xlu0 %v4160_v50 }
  0x51   :  { %571 = vbcast.lane.b32.xlu1 %v569_v51, 256  ;;  %564 = vbcast.lane.b32.xlu0 %v562_v52, 256  ;;  %v779_v52 = vrot.slane %v299_v34, %v2949_v5 }
  0x55   :  { %585 = vbcast.lane.b32.xlu1 %v583_v53, 256  ;;  %578 = vbcast.lane.b32.xlu0 %v576_v54, 256  ;;  %v772_v53 = vrot.slane %v299_v34, %v2943_v3 }
  0x59   :  { %599 = vbcast.lane.b32.xlu1 %v597_v56, 256  ;;  %592 = vbcast.lane.b32.xlu0 %v590_v57, 256  ;;  %v3076_v56 = vsub.s32 %v1239_v44, %v2937_v1 }
  0x5d   :  { %613 = vbcast.lane.b32.xlu1 %v611_v58, 256  ;;  %606 = vbcast.lane.b32.xlu0 %v604_v59, 256 }
  0x61   :  { %627 = vbcast.lane.b32.xlu1 %v625_v60, 256  ;;  %620 = vbcast.lane.b32.xlu0 %v618_v61, 256  ;;  %v793_v61 = vrot.slane %v299_v34, %v2959_v11 }
  0x65   :  { %641 = vbcast.lane.b32.xlu1 %v639_v62, 256  ;;  %634 = vbcast.lane.b32.xlu0 %v632_v63, 256  ;;  %v786_v62 = vrot.slane %v299_v34, %v2962_v12 }
  0x69   :  { %655 = vbcast.lane.b32.xlu1 %v653_v2, 256  ;;  %648 = vbcast.lane.b32.xlu0 %v646_v7, 256 }
  0x6d   :  { %669 = vbcast.lane.b32.xlu1 %v667_v8, 256  ;;  %662 = vbcast.lane.b32.xlu0 %v660_v9, 256  ;;  %v807_v8 = vrot.slane %v299_v34, %v2967_v15  ;;  %v800_v9 = vrot.slane %v299_v34, %v2970_v16 }
  0x71   :  { %683 = vbcast.lane.b32.xlu1 %v681_v10, 256  ;;  %676 = vbcast.lane.b32.xlu0 %v674_v13, 256  ;;  %v300_v13 = vld [vmem:[%s4153_s1 + $0x48] sm:$0xff] }
  0x72   :  { %v849_v36 = vrot.slane %v300_v13, %v2959_v11  ;;  %v856_v44 = vrot.slane %v300_v13, %v2970_v16 }
  0x75   :  { %697 = vbcast.lane.b32.xlu1 %v695_v14, 256  ;;  %690 = vbcast.lane.b32.xlu0 %v688_v17, 256 }
  0x79   :  { %711 = vbcast.lane.b32.xlu1 %v709_v19, 256  ;;  %704 = vbcast.lane.b32.xlu0 %v702_v20, 256  ;;  %v821_v20 = vrot.slane %v300_v13, %v2952_v6 }
  0x7b   :  { %v327_v23 = vpop.permute.xlu1 %326  ;;  %v313_v24 = vpop.permute.xlu0 %312 }
  0x7c   :  { %v1203_v41 = vcombine.low %v313_v24, %v327_v23 }
  0x7d   :  { %725 = vbcast.lane.b32.xlu1 %v723_v21, 256  ;;  %718 = vbcast.lane.b32.xlu0 %v716_v22, 256  ;;  %v814_v21 = vrot.slane %v300_v13, %v2946_v4 }
  0x7e   :  { %v3065_v51 = vrot.slane %v1203_v41, %v3055_v40 }
  0x7f   :  { %v334_v29 = vpop.permute.xlu1 %333  ;;  %v320_v30 = vpop.permute.xlu0 %319 }
  0x80   :  { %v1211_v37 = vcombine.low %v320_v30, %v334_v29  ;;  %v828_v29 = vrot.slane %v300_v13, %v2943_v3 }
  0x81   :  { %739 = vbcast.lane.b32.xlu1 %v737_v27, 256  ;;  %732 = vbcast.lane.b32.xlu0 %v730_v28, 256  ;;  %v835_v28 = vrot.slane %v300_v13, %v2949_v5 }
  0x82   :  { %v3060_v45 = vrot.slane %v1211_v37, %v3055_v40  ;;  %v842_v37 = vrot.slane %v300_v13, %v2962_v12 }
  0x83   :  { %v348_v38 = vpop.permute.xlu1 %347  ;;  %v341_v39 = vpop.permute.xlu0 %340 }
  0x84   :  { %v1235_v57 = vcombine.low %v3065_v51, %v3060_v45 }
  0x85   :  { %753 = vbcast.lane.b32.xlu1 %v751_v32, 256  ;;  %746 = vbcast.lane.b32.xlu0 %v744_v33, 256 }
  0x86   :  { %v3088_v0 = vrot.slane %v1235_v57, %v3076_v56 }
  0x87   :  { %v362_v46 = vpop.permute.xlu1 %361  ;;  %v355_v47 = vpop.permute.xlu0 %354 }
  0x88   :  { %v1227_v48 = vcombine.low %v348_v38, %v362_v46  ;;  %v1219_v49 = vcombine.low %v341_v39, %v355_v47  ;;  %4199 = vst [vmem:[#allocation10_spill] sm:$0xff] %v3088_v0  ;;  %v301_v47 = vld [vmem:[%s4153_s1 + $0x50] sm:$0xff] }
  0x89   :  { %767 = vbcast.lane.b32.xlu1 %v765_v42, 256  ;;  %760 = vbcast.lane.b32.xlu0 %v758_v43, 256  ;;  %v863_v43 = vrot.slane %v300_v13, %v2967_v15  ;;  %v877_v57 = vrot.slane %v301_v47, %v2952_v6 }
  0x8a   :  { %v3070_v54 = vrot.slane %v1227_v48, %v3055_v40  ;;  %v3073_v55 = vrot.slane %v1219_v49, %v3055_v40 }
  0x8b   :  { %v376_v58 = vpop.permute.xlu1 %375  ;;  %v369_v59 = vpop.permute.xlu0 %368 }
  0x8c   :  { %v1251_v60 = vcombine.low %v3073_v55, %v3070_v54 }
  0x8d   :  { %781 = vbcast.lane.b32.xlu1 %v779_v52, 256  ;;  %774 = vbcast.lane.b32.xlu0 %v772_v53, 256 }
  0x8e   :  { %v3085_v63 = vrot.slane %v1251_v60, %v3076_v56 }
  0x8f   :  { %v390_v2 = vpop.permute.xlu1 %389  ;;  %v383_v7 = vpop.permute.xlu0 %382 }
  0x90   :  { %4198 = vst [vmem:[#allocation9_spill] sm:$0xff] %v3085_v63  ;;  %v1279_v14 = vcombine.low %v376_v58, %v390_v2  ;;  %v1271_v17 = vcombine.low %v369_v59, %v383_v7  ;;  %v870_v58 = vrot.slane %v301_v47, %v2946_v4 }
  0x91   :  { %795 = vbcast.lane.b32.xlu1 %v793_v61, 256  ;;  %788 = vbcast.lane.b32.xlu0 %v786_v62, 256 }
  0x92   :  { %v3100_v22 = vrot.slane %v1279_v14, %v3055_v40  ;;  %v3103_v23 = vrot.slane %v1271_v17, %v3055_v40 }
  0x93   :  { %v404_v18 = vpop.permute.xlu1 %403  ;;  %v397_v19 = vpop.permute.xlu0 %396 }
  0x94   :  { %v1303_v32 = vcombine.low %v3103_v23, %v3100_v22 }
  0x95   :  { %809 = vbcast.lane.b32.xlu1 %v807_v8, 256  ;;  %802 = vbcast.lane.b32.xlu0 %v800_v9, 256  ;;  %v891_v8 = vrot.slane %v301_v47, %v2949_v5  ;;  %v884_v9 = vrot.slane %v301_v47, %v2943_v3 }
  0x96   :  { %v3123_v39 = vrot.slane %v1303_v32, %v3076_v56  ;;  %v912_v32 = vrot.slane %v301_v47, %v2970_v16 }
  0x97   :  { %v418_v24 = vpop.permute.xlu1 %417  ;;  %v411_v25 = vpop.permute.xlu0 %410 }
  0x98   :  { %v1295_v26 = vcombine.low %v404_v18, %v418_v24  ;;  %v1287_v27 = vcombine.low %v397_v19, %v411_v25  ;;  %4201 = vst [vmem:[#allocation12_spill] sm:$0xff] %v3123_v39  ;;  %v898_v24 = vrot.slane %v301_v47, %v2962_v12 }
  0x99   :  { %823 = vbcast.lane.b32.xlu1 %v821_v20, 256  ;;  %816 = vbcast.lane.b32.xlu0 %v814_v21, 256  ;;  %v905_v21 = vrot.slane %v301_v47, %v2959_v11 }
  0x9a   :  { %v3108_v30 = vrot.slane %v1295_v26, %v3055_v40  ;;  %v3111_v31 = vrot.slane %v1287_v27, %v3055_v40 }
  0x9b   :  { %v432_v33 = vpop.permute.xlu1 %431  ;;  %v425_v34 = vpop.permute.xlu0 %424 }
  0x9c   :  { %v1319_v35 = vcombine.low %v3111_v31, %v3108_v30 }
  0x9d   :  { %837 = vbcast.lane.b32.xlu1 %v835_v28, 256  ;;  %830 = vbcast.lane.b32.xlu0 %v828_v29, 256  ;;  %v919_v29 = vrot.slane %v301_v47, %v2967_v15 }
  0x9e   :  { %v3120_v38 = vrot.slane %v1319_v35, %v3076_v56 }
  0x9f   :  { %v446_v41 = vpop.permute.xlu1 %445  ;;  %v439_v42 = vpop.permute.xlu0 %438 }
  0xa0   :  { %4200 = vst [vmem:[#allocation11_spill] sm:$0xff] %v3120_v38  ;;  %v1347_v48 = vcombine.low %v432_v33, %v446_v41  ;;  %v1339_v49 = vcombine.low %v425_v34, %v439_v42  ;;  %v302_v34 = vld [vmem:[%s4153_s1 + $0x58] sm:$0xff] }
  0xa1   :  { %851 = vbcast.lane.b32.xlu1 %v849_v36, 256  ;;  %844 = vbcast.lane.b32.xlu0 %v842_v37, 256  ;;  %v933_v42 = vrot.slane %v302_v34, %v2952_v6 }
  0xa2   :  { %v3135_v59 = vrot.slane %v1347_v48, %v3055_v40  ;;  %v3138_v60 = vrot.slane %v1339_v49, %v3055_v40 }
  0xa3   :  { %v460_v52 = vpop.permute.xlu1 %459  ;;  %v453_v53 = vpop.permute.xlu0 %452 }
  0xa4   :  { %v1371_v17 = vcombine.low %v3138_v60, %v3135_v59 }
  0xa5   :  { %865 = vbcast.lane.b32.xlu1 %v863_v43, 256  ;;  %858 = vbcast.lane.b32.xlu0 %v856_v44, 256  ;;  %v926_v43 = vrot.slane %v302_v34, %v2946_v4 }
  0xa6   :  { %v3158_v26 = vrot.slane %v1371_v17, %v3076_v56  ;;  %v961_v17 = vrot.slane %v302_v34, %v2959_v11 }
  0xa7   :  { %v474_v61 = vpop.permute.xlu1 %473  ;;  %v467_v62 = vpop.permute.xlu0 %466 }
  0xa8   :  { %v1363_v2 = vcombine.low %v460_v52, %v474_v61  ;;  %v1355_v7 = vcombine.low %v453_v53, %v467_v62 }
  0xa9   :  { %879 = vbcast.lane.b32.xlu1 %v877_v57, 256  ;;  %872 = vbcast.lane.b32.xlu0 %v870_v58, 256  ;;  %v947_v57 = vrot.slane %v302_v34, %v2949_v5  ;;  %v940_v58 = vrot.slane %v302_v34, %v2943_v3 }
  0xaa   :  { %v3143_v13 = vrot.slane %v1363_v2, %v3055_v40  ;;  %v3146_v14 = vrot.slane %v1355_v7, %v3055_v40 }
  0xab   :  { %v488_v18 = vpop.permute.xlu1 %487  ;;  %v481_v19 = vpop.permute.xlu0 %480 }
  0xac   :  { %v1387_v20 = vcombine.low %v3146_v14, %v3143_v13 }
  0xad   :  { %893 = vbcast.lane.b32.xlu1 %v891_v8, 256  ;;  %886 = vbcast.lane.b32.xlu0 %v884_v9, 256 }
  0xae   :  { %v3155_v25 = vrot.slane %v1387_v20, %v3076_v56 }
  0xaf   :  { %v502_v27 = vpop.permute.xlu1 %501  ;;  %v495_v28 = vpop.permute.xlu0 %494 }
  0xb0   :  { %4202 = vst [vmem:[#allocation13_spill] sm:$0xff] %v3155_v25  ;;  %v1415_v35 = vcombine.low %v488_v18, %v502_v27  ;;  %v1407_v36 = vcombine.low %v481_v19, %v495_v28  ;;  %v954_v18 = vrot.slane %v302_v34, %v2962_v12  ;;  %v975_v27 = vrot.slane %v302_v34, %v2967_v15 }
  0xb1   :  { %907 = vbcast.lane.b32.xlu1 %v905_v21, 256  ;;  %900 = vbcast.lane.b32.xlu0 %v898_v24, 256  ;;  %v968_v28 = vrot.slane %v302_v34, %v2970_v16 }
  0xb2   :  { %v3170_v44 = vrot.slane %v1415_v35, %v3055_v40  ;;  %v3173_v47 = vrot.slane %v1407_v36, %v3055_v40 }
  0xb3   :  { %v516_v37 = vpop.permute.xlu1 %515  ;;  %v509_v41 = vpop.permute.xlu0 %508 }
  0xb4   :  { %v1439_v2 = vcombine.low %v3173_v47, %v3170_v44 }
  0xb5   :  { %921 = vbcast.lane.b32.xlu1 %v919_v29, 256  ;;  %914 = vbcast.lane.b32.xlu0 %v912_v32, 256  ;;  %v303_v32 = vld [vmem:[%s4153_s1 + $0x60] sm:$0xff] }
  0xb6   :  { %v3193_v20 = vrot.slane %v1439_v2, %v3076_v56  ;;  %v996_v2 = vrot.slane %v303_v32, %v2943_v3 }
  0xb7   :  { %v530_v48 = vpop.permute.xlu1 %529  ;;  %v523_v49 = vpop.permute.xlu0 %522 }
  0xb8   :  { %v1431_v52 = vcombine.low %v516_v37, %v530_v48  ;;  %v1423_v53 = vcombine.low %v509_v41, %v523_v49  ;;  %4204 = vst [vmem:[#allocation15_spill] sm:$0xff] %v3193_v20 }
  0xb9   :  { %935 = vbcast.lane.b32.xlu1 %v933_v42, 256  ;;  %928 = vbcast.lane.b32.xlu0 %v926_v43, 256  ;;  %v989_v42 = vrot.slane %v303_v32, %v2952_v6  ;;  %v982_v43 = vrot.slane %v303_v32, %v2946_v4 }
  0xba   :  { %v3178_v61 = vrot.slane %v1431_v52, %v3055_v40  ;;  %v3181_v62 = vrot.slane %v1423_v53, %v3055_v40 }
  0xbb   :  { %v544_v7 = vpop.permute.xlu1 %543  ;;  %v537_v8 = vpop.permute.xlu0 %536 }
  0xbc   :  { %v1455_v9 = vcombine.low %v3181_v62, %v3178_v61 }
  0xbd   :  { %949 = vbcast.lane.b32.xlu1 %v947_v57, 256  ;;  %942 = vbcast.lane.b32.xlu0 %v940_v58, 256  ;;  %v1003_v58 = vrot.slane %v303_v32, %v2949_v5 }
  0xbe   :  { %v3190_v19 = vrot.slane %v1455_v9, %v3076_v56 }
  0xbf   :  { %v558_v21 = vpop.permute.xlu1 %557  ;;  %v551_v24 = vpop.permute.xlu0 %550 }
  0xc0   :  { %4203 = vst [vmem:[#allocation14_spill] sm:$0xff] %v3190_v19  ;;  %v1483_v35 = vcombine.low %v544_v7, %v558_v21  ;;  %v1475_v36 = vcombine.low %v537_v8, %v551_v24  ;;  %v1017_v24 = vrot.slane %v303_v32, %v2959_v11 }
  0xc1   :  { %963 = vbcast.lane.b32.xlu1 %v961_v17, 256  ;;  %956 = vbcast.lane.b32.xlu0 %v954_v18, 256 }
  0xc2   :  { %v3205_v48 = vrot.slane %v1483_v35, %v3055_v40  ;;  %v3208_v34 = vrot.slane %v1475_v36, %v3055_v40 }
  0xc3   :  { %v572_v37 = vpop.permute.xlu1 %571  ;;  %v565_v41 = vpop.permute.xlu0 %564 }
  0xc4   :  { %v1507_v9 = vcombine.low %v3208_v34, %v3205_v48 }
  0xc5   :  { %977 = vbcast.lane.b32.xlu1 %v975_v27, 256  ;;  %970 = vbcast.lane.b32.xlu0 %v968_v28, 256  ;;  %v1010_v27 = vrot.slane %v303_v32, %v2962_v12 }
  0xc6   :  { %v3228_v35 = vrot.slane %v1507_v9, %v3076_v56 }
  0xc7   :  { %v586_v49 = vpop.permute.xlu1 %585  ;;  %v579_v52 = vpop.permute.xlu0 %578 }
  0xc8   :  { %v1499_v53 = vcombine.low %v572_v37, %v586_v49  ;;  %v1491_v57 = vcombine.low %v565_v41, %v579_v52  ;;  %v1031_v41 = vrot.slane %v303_v32, %v2967_v15 }
  0xc9   :  { %991 = vbcast.lane.b32.xlu1 %v989_v42, 256  ;;  %984 = vbcast.lane.b32.xlu0 %v982_v43, 256  ;;  %v1024_v42 = vrot.slane %v303_v32, %v2970_v16 }
  0xca   :  { %v3213_v7 = vrot.slane %v1499_v53, %v3055_v40  ;;  %v3216_v8 = vrot.slane %v1491_v57, %v3055_v40  ;;  %v304_v53 = vld [vmem:[%s4153_s1 + $0x68] sm:$0xff] }
  0xcb   :  { %v600_v17 = vpop.permute.xlu1 %599  ;;  %v593_v18 = vpop.permute.xlu0 %592  ;;  %v1038_v9 = vrot.slane %v304_v53, %v2946_v4 }
  0xcc   :  { %v1523_v21 = vcombine.low %v3216_v8, %v3213_v7 }
  0xcd   :  { %1005 = vbcast.lane.b32.xlu1 %v1003_v58, 256  ;;  %998 = vbcast.lane.b32.xlu0 %v996_v2, 256  ;;  %v1045_v2 = vrot.slane %v304_v53, %v2952_v6 }
  0xce   :  { %v3225_v28 = vrot.slane %v1523_v21, %v3076_v56 }
  0xcf   :  { %v614_v36 = vpop.permute.xlu1 %613  ;;  %v607_v37 = vpop.permute.xlu0 %606 }
  0xd0   :  { %v1551_v49 = vcombine.low %v600_v17, %v614_v36  ;;  %v1543_v52 = vcombine.low %v593_v18, %v607_v37  ;;  %v1059_v36 = vrot.slane %v304_v53, %v2949_v5  ;;  %v1052_v37 = vrot.slane %v304_v53, %v2943_v3 }
  0xd1   :  { %1019 = vbcast.lane.b32.xlu1 %v1017_v24, 256  ;;  %1012 = vbcast.lane.b32.xlu0 %v1010_v27, 256 }
  0xd2   :  { %v1558_v21 = vrot.slane %v1551_v49, %v3055_v40  ;;  %v1550_v32 = vrot.slane %v1543_v52, %v3055_v40 }
  0xd3   :  { %v628_v57 = vpop.permute.xlu1 %627  ;;  %v621_v58 = vpop.permute.xlu0 %620 }
  0xd5   :  { %1033 = vbcast.lane.b32.xlu1 %v1031_v41, 256  ;;  %1026 = vbcast.lane.b32.xlu0 %v1024_v42, 256  ;;  %v1575_v41 = vcombine.low %v1550_v32, %v1558_v21  ;;  %v1576_v42 = vcombine.high %v1550_v32, %v1558_v21 }
  0xd7   :  { %v642_v24 = vpop.permute.xlu1 %641  ;;  %v635_v27 = vpop.permute.xlu0 %634 }
  0xd8   :  { %v1567_v17 = vcombine.low %v628_v57, %v642_v24  ;;  %v1559_v18 = vcombine.low %v621_v58, %v635_v27  ;;  %v1073_v57 = vrot.slane %v304_v53, %v2959_v11  ;;  %v1066_v58 = vrot.slane %v304_v53, %v2962_v12 }
  0xd9   :  { %1047 = vbcast.lane.b32.xlu1 %v1045_v2, 256  ;;  %1040 = vbcast.lane.b32.xlu0 %v1038_v9, 256  ;;  %v3248_v2 = vrot.slane %v1575_v41, %v3076_v56  ;;  %v3251_v9 = vrot.slane %v1576_v42, %v3076_v56 }
  0xda   :  { %v1574_v43 = vrot.slane %v1567_v17, %v3055_v40  ;;  %v1566_v29 = vrot.slane %v1559_v18, %v3055_v40  ;;  %v1080_v18 = vrot.slane %v304_v53, %v2970_v16 }
  0xdb   :  { %v656_v33 = vpop.permute.xlu1 %655  ;;  %v649_v49 = vpop.permute.xlu0 %648  ;;  %4205 = vst [vmem:[#allocation16_spill] sm:$0xff] %v3248_v2 }
  0xdc   :  { %v1591_v46 = vcombine.low %v1566_v29, %v1574_v43  ;;  %v1592_v52 = vcombine.high %v1566_v29, %v1574_v43  ;;  %v1087_v43 = vrot.slane %v304_v53, %v2967_v15 }
  0xdd   :  { %1061 = vbcast.lane.b32.xlu1 %v1059_v36, 256  ;;  %1054 = vbcast.lane.b32.xlu0 %v1052_v37, 256  ;;  %v305_v37 = vld [vmem:[%s4153_s1 + $0x70] sm:$0xff] }
  0xde   :  { %v3254_v21 = vrot.slane %v1591_v46, %v3076_v56  ;;  %v3257_v32 = vrot.slane %v1592_v52, %v3076_v56  ;;  %v1094_v53 = vrot.slane %v305_v37, %v2946_v4 }
  0xdf   :  { %v670_v24 = vpop.permute.xlu1 %669  ;;  %v663_v29 = vpop.permute.xlu0 %662 }
  0xe0   :  { %4206 = vst [vmem:[#allocation17_spill] sm:$0xff] %v3254_v21  ;;  %v1619_v41 = vcombine.low %v656_v33, %v670_v24  ;;  %v1611_v42 = vcombine.low %v649_v49, %v663_v29  ;;  %v1115_v33 = vrot.slane %v305_v37, %v2949_v5  ;;  %v1108_v49 = vrot.slane %v305_v37, %v2943_v3 }
  0xe1   :  { %1075 = vbcast.lane.b32.xlu1 %v1073_v57, 256  ;;  %1068 = vbcast.lane.b32.xlu0 %v1066_v58, 256  ;;  %v1101_v57 = vrot.slane %v305_v37, %v2952_v6 }
  0xe2   :  { %v3275_v58 = vrot.slane %v1619_v41, %v3055_v40  ;;  %v3278_v46 = vrot.slane %v1611_v42, %v3055_v40 }
  0xe3   :  { %v684_v52 = vpop.permute.xlu1 %683  ;;  %v677_v10 = vpop.permute.xlu0 %676 }
  0xe4   :  { %4207 = vst [vmem:[#allocation18_spill] sm:$0xff] %v3275_v58  ;;  %4208 = vst [vmem:[#allocation19_spill] sm:$0xff] %v3278_v46 }
  0xe5   :  { %1089 = vbcast.lane.b32.xlu1 %v1087_v43, 256  ;;  %1082 = vbcast.lane.b32.xlu0 %v1080_v18, 256  ;;  %v1643_v43 = vcombine.low %v3278_v46, %v3275_v58 }
  0xe7   :  { %v698_v36 = vpop.permute.xlu1 %697  ;;  %v691_v17 = vpop.permute.xlu0 %690 }
  0xe8   :  { %v1635_v27 = vcombine.low %v684_v52, %v698_v36  ;;  %v1627_v50 = vcombine.low %v677_v10, %v691_v17  ;;  %v1129_v17 = vrot.slane %v305_v37, %v2959_v11  ;;  %v1122_v36 = vrot.slane %v305_v37, %v2962_v12 }
  0xe9   :  { %1103 = vbcast.lane.b32.xlu1 %v1101_v57, 256  ;;  %1096 = vbcast.lane.b32.xlu0 %v1094_v53, 256  ;;  %v1143_v57 = vrot.slane %v305_v37, %v2967_v15  ;;  %v1136_v53 = vrot.slane %v305_v37, %v2970_v16 }
  0xea   :  { %v3283_v24 = vrot.slane %v1635_v27, %v3055_v40  ;;  %v3286_v29 = vrot.slane %v1627_v50, %v3055_v40  ;;  %v3298_v50 = vrot.slane %v1643_v43, %v3076_v56 }
  0xeb   :  { %v712_v18 = vpop.permute.xlu1 %711  ;;  %v705_v41 = vpop.permute.xlu0 %704 }
  0xec   :  { %4209 = vst [vmem:[#allocation20_spill] sm:$0xff] %v3286_v29  ;;  %v1659_v10 = vcombine.low %v3286_v29, %v3283_v24  ;;  %4211 = vst [vmem:[#allocation22_spill] sm:$0xff] %v3298_v50 }
  0xed   :  { %1117 = vbcast.lane.b32.xlu1 %v1115_v33, 256  ;;  %1110 = vbcast.lane.b32.xlu0 %v1108_v49, 256  ;;  %v306_v49 = vld [vmem:[%s4153_s1 + $0x78] sm:$0xff] }
  0xee   :  { %v3295_v27 = vrot.slane %v1659_v10, %v3076_v56 }
  0xef   :  { %v726_v42 = vpop.permute.xlu1 %725  ;;  %v719_v52 = vpop.permute.xlu0 %718 }
  0xf0   :  { %4210 = vst [vmem:[#allocation21_spill] sm:$0xff] %v3295_v27  ;;  %v1687_v10 = vcombine.low %v712_v18, %v726_v42  ;;  %v1679_v1 = vcombine.low %v705_v41, %v719_v52  ;;  %v1171_v18 = vrot.slane %v306_v49, %v2949_v5  ;;  %v1164_v41 = vrot.slane %v306_v49, %v2943_v3 }
  0xf1   :  { %1131 = vbcast.lane.b32.xlu1 %v1129_v17, 256  ;;  %1124 = vbcast.lane.b32.xlu0 %v1122_v36, 256  ;;  %v1157_v17 = vrot.slane %v306_v49, %v2952_v6  ;;  %v1150_v36 = vrot.slane %v306_v49, %v2946_v4 }
  0xf2   :  { %v1694_v58 = vrot.slane %v1687_v10, %v3055_v40  ;;  %v1686_v37 = vrot.slane %v1679_v1, %v3055_v40 }
  0xf3   :  { %v740_v46 = vpop.permute.xlu1 %739  ;;  %v733_v43 = vpop.permute.xlu0 %732 }
  0xf5   :  { %1145 = vbcast.lane.b32.xlu1 %v1143_v57, 256  ;;  %1138 = vbcast.lane.b32.xlu0 %v1136_v53, 256  ;;  %v1711_v57 = vcombine.low %v1686_v37, %v1694_v58  ;;  %v1712_v53 = vcombine.high %v1686_v37, %v1694_v58 }
  0xf7   :  { %v754_v29 = vpop.permute.xlu1 %753  ;;  %v747_v33 = vpop.permute.xlu0 %746  ;;  %v3327_v58 = vrot.slane %v1712_v53, %v3076_v56 }
  0xf8   :  { %v1703_v50 = vcombine.low %v740_v46, %v754_v29  ;;  %v1695_v27 = vcombine.low %v733_v43, %v747_v33  ;;  %v1185_v46 = vrot.slane %v306_v49, %v2959_v11  ;;  %v1178_v29 = vrot.slane %v306_v49, %v2962_v12  ;;  %v38_v12 = vld [vmem:[%s4152_s0 + $0x18] sm:$0xff] }
  0xf9   :  { %1159 = vbcast.lane.b32.xlu1 %v1157_v17, 256  ;;  %1152 = vbcast.lane.b32.xlu0 %v1150_v36, 256  ;;  %v1199_v43 = vrot.slane %v306_v49, %v2967_v15  ;;  %v1192_v11 = vrot.slane %v306_v49, %v2970_v16  ;;  %v3338_v15 = vld [vmem:[%s4152_s0 + $0x8] sm:$0xff]  ;;  %v35_v16 = vld [vmem:[%s4152_s0] sm:$0xff] }
  0xfa   :  { %v1710_v42 = vrot.slane %v1703_v50, %v3055_v40  ;;  %v1702_v52 = vrot.slane %v1695_v27, %v3055_v40  ;;  %v3324_v27 = vrot.slane %v1711_v57, %v3076_v56 }
  0xfb   :  { %v768_v6 = vpop.permute.xlu1 %767  ;;  %v761_v10 = vpop.permute.xlu0 %760 }
  0xfc   :  { %v1727_v4 = vcombine.low %v1702_v52, %v1710_v42  ;;  %v1728_v1 = vcombine.high %v1702_v52, %v1710_v42  ;;  %4213 = vst [vmem:[#allocation24_spill] sm:$0xff] %v3324_v27 }
  0xfd   :  { %1173 = vbcast.lane.b32.xlu1 %v1171_v18, 256  ;;  %1166 = vbcast.lane.b32.xlu0 %v1164_v41, 256 }
  0xfe   :  { %v3318_v5 = vrot.slane %v1727_v4, %v3076_v56  ;;  %v3321_v3 = vrot.slane %v1728_v1, %v3076_v56  ;;  %v3359_v1 = vld [vmem:[%s4152_s0 + $0x20] sm:$0xff] }
  0xff   :  { %v782_v50 = vpop.permute.xlu1 %781  ;;  %v775_v33 = vpop.permute.xlu0 %774 }
 0x100   :  { %4212 = vst [vmem:[#allocation23_spill] sm:$0xff] %v3318_v5  ;;  %v1755_v17 = vcombine.low %v768_v6, %v782_v50  ;;  %v1747_v36 = vcombine.low %v761_v10, %v775_v33 }
 0x101   :  { %1187 = vbcast.lane.b32.xlu1 %v1185_v46, 256  ;;  %1180 = vbcast.lane.b32.xlu0 %v1178_v29, 256  ;;  %v1252_v46 = vcombine.high %v3073_v55, %v3070_v54 }
 0x102   :  { %v3344_v49 = vrot.slane %v1755_v17, %v3055_v40  ;;  %v3347_v41 = vrot.slane %v1747_v36, %v3055_v40  ;;  %v4173_v17 = vmov 1  }
 0x103   :  { %v796_v37 = vpop.permute.xlu1 %795  ;;  %v789_v18 = vpop.permute.xlu0 %788  ;;  %v1266_v54 = vrot.slane %v1252_v46, %v3076_v56 }
 0x104   :  { %4214 = vst [vmem:[#allocation25_spill] sm:$0xff] %v3344_v49  ;;  %4215 = vst [vmem:[#allocation26_spill] sm:$0xff] %v3347_v41  ;;  %v1779_v29 = vcombine.low %v3347_v41, %v3344_v49 }
 0x105   :  { %1201 = vbcast.lane.b32.xlu1 %v1199_v43, 256  ;;  %1194 = vbcast.lane.b32.xlu0 %v1192_v11, 256  ;;  %v1236_v11 = vcombine.high %v3065_v51, %v3060_v45  ;;  %v3383_v45 = vld [vmem:[%s4152_s0 + $0x10] sm:$0xff] }
 0x106   :  { %v3376_v55 = vrot.slane %v1779_v29, %v3076_v56 }
 0x107   :  { %v810_v6 = vpop.permute.xlu1 %809  ;;  %v803_v42 = vpop.permute.xlu0 %802  ;;  %v1250_v51 = vrot.slane %v1236_v11, %v3076_v56 }
 0x108   :  { %v1771_v52 = vcombine.low %v796_v37, %v810_v6  ;;  %v1763_v57 = vcombine.low %v789_v18, %v803_v42  ;;  %4217 = vst [vmem:[#allocation28_spill] sm:$0xff] %v3376_v55  ;;  %v1268_v6 = vcombine.high %v3088_v0, %v3085_v63  ;;  %v4218_v42 = vmov 0  }
 0x109   :  { %60 = vperm.xlu1 %2843, %v3338_v15   ;;  %55 = vperm.xlu0 %2842, %v35_v16   ;;  %v1304_v0 = vcombine.high %v3103_v23, %v3100_v22  ;;  %v3510_v22 = vld [vmem:[%s4152_s0 + $0x60] sm:$0xff] }
 0x10a   :  { %v3351_v53 = vrot.slane %v1771_v52, %v3055_v40  ;;  %v3354_v10 = vrot.slane %v1763_v57, %v3055_v40 }
 0x10b   :  { %v824_v50 = vpop.permute.xlu1 %823  ;;  %v817_v33 = vpop.permute.xlu0 %816  ;;  %v1318_v23 = vrot.slane %v1304_v0, %v3076_v56  ;;  %v1744_v0 = vcombine.high %v3324_v27, %v3318_v5 }
 0x10c   :  { %v1795_v43 = vcombine.low %v3354_v10, %v3351_v53 }
 0x10d   :  { %2844 = vset.pattern.permute.xlu1 %v4173_v17  ;;  %75 = vperm.xlu0 %2842, %v3359_v1  }
 0x10e   :  { %v3372_v36 = vrot.slane %v1795_v43, %v3076_v56  ;;  %176 = vperm.xlu1 %2844, %v35_v16   ;;  %v1269_v43 = vcombine.low %v1250_v51, %v1266_v54 }
 0x10f   :  { %v838_v37 = vpop.permute.xlu1 %837  ;;  %v831_v18 = vpop.permute.xlu0 %830 }
 0x110   :  { %4216 = vst [vmem:[#allocation27_spill] sm:$0xff] %v3372_v36  ;;  %v1823_v52 = vcombine.low %v824_v50, %v838_v37  ;;  %v1815_v57 = vcombine.low %v817_v33, %v831_v18  ;;  %v1270_v37 = vcombine.high %v1250_v51, %v1266_v54 }
 0x111   :  { %2307 = vrot.lane.b32.xlu0 %v1268_v6, %s2888_s17 }
 0x112   :  { %2845 = vset.pattern.permute.xlu1 %v4218_v42  ;;  %v3396_v11 = vrot.slane %v1823_v52, %v3055_v40  ;;  %v3399_v6 = vrot.slane %v1815_v57, %v3055_v40  ;;  %v3411_v52 = vld [vmem:[%s4152_s0 + $0x40] sm:$0xff]  ;;  %v1456_v57 = vcombine.high %v3181_v62, %v3178_v61  ;;  %v3429_v61 = vld [vmem:[%s4152_s0 + $0x28] sm:$0xff] }
 0x113   :  { %v852_v46 = vpop.permute.xlu1 %851  ;;  %v845_v29 = vpop.permute.xlu0 %844  ;;  %65 = vperm.xlu1 %2845, %v3383_v45  }
 0x114   :  { %v1847_v54 = vcombine.low %v3399_v6, %v3396_v11  ;;  %v3432_v62 = vrot.slane %v1456_v57, %v3076_v56 }
 0x115   :  { %2371 = vrot.lane.b32.xlu0 %v1269_v43, %s2889_s20 }
 0x117   :  { %v866_v50 = vpop.permute.xlu1 %865  ;;  %v859_v33 = vpop.permute.xlu0 %858  ;;  %70 = vperm.xlu1 %2845, %v38_v12  }
 0x118   :  { %v1839_v18 = vcombine.low %v852_v46, %v866_v50  ;;  %v1831_v16 = vcombine.low %v845_v29, %v859_v33  ;;  %v3435_v33 = vrot.slane %v1847_v54, %v3076_v56 }
 0x119   :  { %2435 = vrot.lane.b32.xlu0 %v1270_v37, %s2890_s21 }
 0x11a   :  { %v3403_v4 = vrot.slane %v1839_v18, %v3055_v40  ;;  %v3406_v43 = vrot.slane %v1831_v16, %v3055_v40  ;;  %v1440_v16 = vcombine.high %v3173_v47, %v3170_v44  ;;  %v1472_v44 = vcombine.high %v3193_v20, %v3190_v19 }
 0x11b   :  { %v880_v51 = vpop.permute.xlu1 %879  ;;  %v873_v46 = vpop.permute.xlu0 %872  ;;  %2846 = vset.pattern.permute.xlu1 %v4173_v17  ;;  %v4219_v19 = vmov 1  }
 0x11c   :  { %v1863_v29 = vcombine.low %v3406_v43, %v3403_v4  ;;  %188 = vperm.xlu1 %2846, %v38_v12   ;;  %v3441_v47 = vrot.slane %v1440_v16, %v3076_v56  ;;  %v3455_v16 = vld [vmem:[%s4152_s0 + $0x50] sm:$0xff] }
 0x11d   :  { %95 = vperm.xlu0 %2842, %v3411_v52  }
 0x11e   :  { %v3424_v50 = vrot.slane %v1863_v29, %v3076_v56  ;;  %v1473_v63 = vcombine.low %v3441_v47, %v3432_v62 }
 0x11f   :  { %v894_v12 = vpop.permute.xlu1 %893  ;;  %v887_v37 = vpop.permute.xlu0 %886 }
 0x120   :  { %2847 = vset.pattern.permute.xlu1 %v4218_v42  ;;  %v1891_v57 = vcombine.low %v880_v51, %v894_v12  ;;  %v1883_v54 = vcombine.low %v873_v46, %v887_v37 }
 0x121   :  { %80 = vperm.xlu1 %2847, %v3429_v61   ;;  %2313 = vrot.lane.b32.xlu0 %v1472_v44, %s2888_s17 }
 0x122   :  { %v3458_v44 = vrot.slane %v1891_v57, %v3055_v40  ;;  %v3461_v51 = vrot.slane %v1883_v54, %v3055_v40 }
 0x123   :  { %v908_v29 = vpop.permute.xlu1 %907  ;;  %v901_v17 = vpop.permute.xlu0 %900 }
 0x124   :  { %v1915_v54 = vcombine.low %v3461_v51, %v3458_v44 }
 0x125   :  { %2848 = vset.pattern.permute.xlu1 %v4219_v19  ;;  %2377 = vrot.lane.b32.xlu0 %v1473_v63, %s2889_s20  ;;  %v3466_v63 = vld [vmem:[%s4152_s0 + $0x30] sm:$0xff] }
 0x126   :  { %192 = vperm.xlu1 %2848, %v3359_v1   ;;  %v3496_v55 = vrot.slane %v1915_v54, %v3076_v56 }
 0x127   :  { %v922_v46 = vpop.permute.xlu1 %921  ;;  %v915_v12 = vpop.permute.xlu0 %914 }
 0x128   :  { %v1907_v37 = vcombine.low %v908_v29, %v922_v46  ;;  %v1899_v18 = vcombine.low %v901_v17, %v915_v12  ;;  %v42_v12 = vld [vmem:[%s4152_s0 + $0x38] sm:$0xff] }
 0x129   :  { %105 = vperm.xlu0 %2842, %v3455_v16  }
 0x12a   :  { %v3470_v1 = vrot.slane %v1907_v37, %v3055_v40  ;;  %v3473_v57 = vrot.slane %v1899_v18, %v3055_v40  ;;  %2849 = vset.pattern.permute.xlu1 %v4218_v42  ;;  %v1320_v18 = vcombine.high %v3111_v31, %v3108_v30  ;;  %v4220_v37 = vcombine.high %v3248_v2, %v3254_v21 }
 0x12b   :  { %v936_v29 = vpop.permute.xlu1 %935  ;;  %v929_v17 = vpop.permute.xlu0 %928  ;;  %85 = vperm.xlu1 %2849, %v3466_v63   ;;  %v4221_v30 = vcombine.low %v3251_v9, %v3257_v32  ;;  %v1336_v31 = vcombine.high %v3123_v39, %v3120_v38 }
 0x12c   :  { %v1931_v46 = vcombine.low %v3473_v57, %v3470_v1  ;;  %v1334_v49 = vrot.slane %v1320_v18, %v3076_v56 }
 0x12d   :  { %2317 = vrot.lane.b32.xlu0 %v4220_v37, %s2888_s17 }
 0x12e   :  { %v3491_v20 = vrot.slane %v1931_v46, %v3076_v56 }
 0x12f   :  { %v950_v36 = vpop.permute.xlu1 %949  ;;  %v943_v41 = vpop.permute.xlu0 %942  ;;  %90 = vperm.xlu1 %2849, %v42_v12  }
 0x130   :  { %v1959_v54 = vcombine.low %v936_v29, %v950_v36  ;;  %v1951_v18 = vcombine.low %v929_v17, %v943_v41 }
 0x131   :  { %2381 = vrot.lane.b32.xlu0 %v4221_v30, %s2889_s20  ;;  %v1337_v30 = vcombine.low %v1318_v23, %v1334_v49 }
 0x132   :  { %v3517_v46 = vrot.slane %v1959_v54, %v3055_v40  ;;  %v3520_v2 = vrot.slane %v1951_v18, %v3055_v40 }
 0x133   :  { %v964_v37 = vpop.permute.xlu1 %963  ;;  %v957_v21 = vpop.permute.xlu0 %956  ;;  %2309 = vrot.lane.b32.xlu1 %v1336_v31, %s2888_s17 }
 0x134   :  { %2850 = vset.pattern.permute.xlu1 %v4219_v19  ;;  %v1983_v31 = vcombine.low %v3520_v2, %v3517_v46 }
 0x135   :  { %115 = vperm.xlu0 %2842, %v3510_v22  }
 0x137   :  { %v978_v38 = vpop.permute.xlu1 %977  ;;  %v971_v39 = vpop.permute.xlu0 %970  ;;  %2373 = vrot.lane.b32.xlu1 %v1337_v30, %s2889_s20  ;;  %v1745_v30 = vcombine.low %v3327_v58, %v3321_v3 }
 0x138   :  { %v1975_v41 = vcombine.low %v964_v37, %v978_v38  ;;  %v1967_v36 = vcombine.low %v957_v21, %v971_v39  ;;  %v1338_v39 = vcombine.high %v1318_v23, %v1334_v49  ;;  %v3545_v37 = vld [vmem:[%s4152_s0 + $0x70] sm:$0xff]  ;;  %v44_v49 = vld [vmem:[%s4152_s0 + $0x48] sm:$0xff]  ;;  %v1388_v23 = vcombine.high %v3146_v14, %v3143_v13 }
 0x139   :  { %2321 = vrot.lane.b32.xlu0 %v1744_v0, %s2888_s17  ;;  %v3548_v0 = vrot.slane %v1983_v31, %v3076_v56  ;;  %v1372_v31 = vcombine.high %v3138_v60, %v3135_v59  ;;  %v1404_v13 = vcombine.high %v3158_v26, %v3155_v25 }
 0x13a   :  { %v3527_v29 = vrot.slane %v1975_v41, %v3055_v40  ;;  %v3530_v17 = vrot.slane %v1967_v36, %v3055_v40  ;;  %v1402_v27 = vrot.slane %v1388_v23, %v3076_v56 }
 0x13b   :  { %v992_v54 = vpop.permute.xlu1 %991  ;;  %v985_v18 = vpop.permute.xlu0 %984  ;;  %204 = vperm.xlu1 %2850, %v42_v12   ;;  %v1386_v14 = vrot.slane %v1372_v31, %v3076_v56 }
 0x13c   :  { %v1999_v38 = vcombine.low %v3530_v17, %v3527_v29 }
 0x13d   :  { %2385 = vrot.lane.b32.xlu0 %v1745_v30, %s2889_s20 }
 0x13e   :  { %v3540_v21 = vrot.slane %v1999_v38, %v3076_v56 }
 0x13f   :  { %v1006_v12 = vpop.permute.xlu1 %1005  ;;  %v999_v41 = vpop.permute.xlu0 %998  ;;  %2437 = vrot.lane.b32.xlu1 %v1338_v39, %s2890_s21 }
 0x140   :  { %2851 = vset.pattern.permute.xlu1 %v4218_v42  ;;  %v2027_v30 = vcombine.low %v992_v54, %v1006_v12  ;;  %v2019_v38 = vcombine.low %v985_v18, %v999_v41  ;;  %v1405_v41 = vcombine.low %v1386_v14, %v1402_v27 }
 0x141   :  { %125 = vperm.xlu0 %2842, %v3545_v37  }
 0x142   :  { %v3569_v36 = vrot.slane %v2027_v30, %v3055_v40  ;;  %v3572_v59 = vrot.slane %v2019_v38, %v3055_v40 }
 0x143   :  { %v1020_v39 = vpop.permute.xlu1 %1019  ;;  %v1013_v5 = vpop.permute.xlu0 %1012  ;;  %100 = vperm.xlu1 %2851, %v44_v49  }
 0x144   :  { %v2051_v31 = vcombine.low %v3572_v59, %v3569_v36 }
 0x145   :  { %2857 = vset.pattern.permute.xlu0 %v4219_v19 }
 0x146   :  { %180 = vperm.xlu0 %2857, %v3338_v15  }
 0x147   :  { %v1034_v60 = vpop.permute.xlu1 %1033  ;;  %v1027_v54 = vpop.permute.xlu0 %1026  ;;  %2311 = vrot.lane.b32.xlu1 %v1404_v13, %s2888_s17  ;;  %v3593_v13 = vrot.slane %v2051_v31, %v3076_v56 }
 0x148   :  { %v2043_v18 = vcombine.low %v1020_v39, %v1034_v60  ;;  %v2035_v12 = vcombine.low %v1013_v5, %v1027_v54  ;;  %2852 = vset.pattern.permute.xlu1 %v4219_v19 }
 0x14a   :  { %v3577_v23 = vrot.slane %v2043_v18, %v3055_v40  ;;  %v3580_v15 = vrot.slane %v2035_v12, %v3055_v40  ;;  %184 = vperm.xlu0 %2857, %v3383_v45   ;;  %v4192_v18 = vmov 0.0   ;;  %v1406_v12 = vcombine.high %v1386_v14, %v1402_v27 }
 0x14b   :  { %v1048_v30 = vpop.permute.xlu1 %1047  ;;  %v1041_v38 = vpop.permute.xlu0 %1040  ;;  %2375 = vrot.lane.b32.xlu1 %v1405_v41, %s2889_s20  ;;  %2774 = vmatprep.subr.bf16.mxu0 %v4192_v18 }
 0x14c   :  { %v2067_v5 = vcombine.low %v3580_v15, %v3577_v23 }
 0x14e   :  { %v3589_v39 = vrot.slane %v2067_v5, %v3076_v56  ;;  %196 = vperm.xlu0 %2857, %v3429_v61  }
 0x14f   :  { %v1062_v60 = vpop.permute.xlu1 %1061  ;;  %v1055_v45 = vpop.permute.xlu0 %1054  ;;  %208 = vperm.xlu1 %2852, %v3411_v52   ;;  %v1474_v52 = vcombine.high %v3441_v47, %v3432_v62 }
 0x150   :  { %v2087_v54 = vcombine.low %v1041_v38, %v1055_v45  ;;  %v2095_v25 = vcombine.low %v1048_v30, %v1062_v60  ;;  %v1524_v45 = vcombine.high %v3216_v8, %v3213_v7  ;;  %v1864_v7 = vcombine.high %v3406_v43, %v3403_v4 }
 0x152   :  { %200 = vperm.xlu0 %2857, %v3466_v63   ;;  %v2102_v31 = vrot.slane %v2095_v25, %v3055_v40  ;;  %v2094_v38 = vrot.slane %v2087_v54, %v3055_v40  ;;  %v46_v63 = vld [vmem:[%s4152_s0 + $0x58] sm:$0xff] }
 0x153   :  { %v1076_v5 = vpop.permute.xlu1 %1075  ;;  %v1069_v61 = vpop.permute.xlu0 %1068  ;;  %2439 = vrot.lane.b32.xlu1 %v1406_v12, %s2890_s21 }
 0x154   :  { %2853 = vset.pattern.permute.xlu1 %v4218_v42  ;;  %v2119_v12 = vcombine.low %v2094_v38, %v2102_v31  ;;  %v2120_v62 = vcombine.high %v2094_v38, %v2102_v31  ;;  %v1538_v31 = vrot.slane %v1524_v45, %v3076_v56  ;;  %v1848_v38 = vcombine.high %v3399_v6, %v3396_v11 }
 0x156   :  { %212 = vperm.xlu0 %2857, %v44_v49   ;;  %v1508_v49 = vcombine.high %v3208_v34, %v3205_v48  ;;  %v1540_v48 = vcombine.high %v3228_v35, %v3225_v28  ;;  %v3629_v34 = vrot.slane %v2119_v12, %v3076_v56 }
 0x157   :  { %v1090_v27 = vpop.permute.xlu1 %1089  ;;  %v1083_v14 = vpop.permute.xlu0 %1082  ;;  %2441 = vrot.lane.b32.xlu1 %v1474_v52, %s2890_s21 }
 0x158   :  { %v2111_v30 = vcombine.low %v1076_v5, %v1090_v27  ;;  %v2103_v60 = vcombine.low %v1069_v61, %v1083_v14  ;;  %v3619_v5 = vld [vmem:[%s4152_s0 + $0x68] sm:$0xff]  ;;  %v3632_v27 = vrot.slane %v2120_v62, %v3076_v56  ;;  %v1522_v43 = vrot.slane %v1508_v49, %v3076_v56 }
 0x15a   :  { %v2118_v25 = vrot.slane %v2111_v30, %v3055_v40  ;;  %v2110_v47 = vrot.slane %v2103_v60, %v3055_v40  ;;  %220 = vperm.xlu0 %2857, %v46_v63   ;;  %v1880_v30 = vcombine.high %v3435_v33, %v3424_v50  ;;  %v1541_v12 = vcombine.low %v1522_v43, %v1538_v31 }
 0x15b   :  { %v1104_v54 = vpop.permute.xlu1 %1103  ;;  %v1097_v52 = vpop.permute.xlu0 %1096  ;;  %110 = vperm.xlu1 %2853, %v46_v63   ;;  %v3644_v63 = vrot.slane %v1864_v7, %v3076_v56 }
 0x15c   :  { %v2135_v8 = vcombine.low %v2110_v47, %v2118_v25  ;;  %v2136_v61 = vcombine.high %v2110_v47, %v2118_v25  ;;  %v3658_v47 = vrot.slane %v1848_v38, %v3076_v56 }
 0x15e   :  { %v3635_v14 = vrot.slane %v2135_v8, %v3076_v56  ;;  %v3638_v4 = vrot.slane %v2136_v61, %v3076_v56  ;;  %228 = vperm.xlu0 %2857, %v3619_v5  }
 0x15f   :  { %v1118_v11 = vpop.permute.xlu1 %1117  ;;  %v1111_v6 = vpop.permute.xlu0 %1110  ;;  %2315 = vrot.lane.b32.xlu1 %v1540_v48, %s2888_s17  ;;  %v1881_v48 = vcombine.low %v3658_v47, %v3644_v63 }
 0x160   :  { %2854 = vset.pattern.permute.xlu1 %v4219_v19  ;;  %v2163_v49 = vcombine.low %v1104_v54, %v1118_v11  ;;  %v2155_v7 = vcombine.low %v1097_v52, %v1111_v6  ;;  %v3675_v54 = vld [vmem:[%s4152_s0 + $0x78] sm:$0xff]  ;;  %v1932_v52 = vcombine.high %v3473_v57, %v3470_v1 }
 0x162   :  { %2325 = vrot.lane.b32.xlu0 %v1880_v30, %s2888_s17  ;;  %v3666_v41 = vrot.slane %v2163_v49, %v3055_v40  ;;  %v3669_v25 = vrot.slane %v2155_v7, %v3055_v40  ;;  %v1542_v30 = vcombine.high %v1522_v43, %v1538_v31  ;;  %v1946_v1 = vrot.slane %v1932_v52, %v3076_v56  ;;  %v4223_v52 = vld [vmem:[#allocation20_spill] sm:$0xff] }
 0x163   :  { %v1132_v8 = vpop.permute.xlu1 %1131  ;;  %v1125_v61 = vpop.permute.xlu0 %1124  ;;  %2379 = vrot.lane.b32.xlu1 %v1541_v12, %s2889_s20  ;;  %v1916_v12 = vcombine.high %v3461_v51, %v3458_v44  ;;  %v1948_v51 = vcombine.high %v3496_v55, %v3491_v20 }
 0x165   :  { %v1930_v57 = vrot.slane %v1916_v12, %v3076_v56 }
 0x166   :  { %2389 = vrot.lane.b32.xlu0 %v1881_v48, %s2889_s20 }
 0x167   :  { %v1146_v38 = vpop.permute.xlu1 %1145  ;;  %v1139_v18 = vpop.permute.xlu0 %1138  ;;  %216 = vperm.xlu1 %2854, %v3455_v16   ;;  %v2187_v16 = vcombine.low %v3669_v25, %v3666_v41 }
 0x168   :  { %v2179_v11 = vcombine.low %v1132_v8, %v1146_v38  ;;  %v2171_v6 = vcombine.low %v1125_v61, %v1139_v18  ;;  %v4222_v61 = vcombine.high %v3251_v9, %v3257_v32  ;;  %v1949_v38 = vcombine.low %v1930_v57, %v1946_v1 }
 0x169   :  { %v3703_v31 = vrot.slane %v2187_v16, %v3076_v56  ;;  %v4224_v16 = vld [vmem:[#allocation18_spill] sm:$0xff]  ;;  %v2068_v9 = vcombine.high %v3580_v15, %v3577_v23  ;;  %v1950_v32 = vcombine.high %v1930_v57, %v1946_v1 }
 0x16a   :  { %v3682_v49 = vrot.slane %v2179_v11, %v3055_v40  ;;  %v3685_v7 = vrot.slane %v2171_v6, %v3055_v40  ;;  %236 = vperm.xlu0 %2857, %v3675_v54   ;;  %v1660_v11 = vcombine.high %v4223_v52, %v3283_v24  ;;  %v4227_v52 = vld [vmem:[#allocation22_spill] sm:$0xff] }
 0x16b   :  { %v1160_v48 = vpop.permute.xlu1 %1159  ;;  %v1153_v62 = vpop.permute.xlu0 %1152  ;;  %2443 = vrot.lane.b32.xlu1 %v1542_v30, %s2890_s21  ;;  %v2082_v1 = vrot.slane %v2068_v9, %v3076_v56 }
 0x16c   :  { %v2203_v44 = vcombine.low %v3685_v7, %v3682_v49  ;;  %2855 = vset.pattern.permute.xlu1 %v4218_v42  ;;  %v1674_v24 = vrot.slane %v1660_v11, %v3076_v56 }
 0x16e   :  { %v3699_v18 = vrot.slane %v2203_v44, %v3076_v56  ;;  %2327 = vrot.lane.b32.xlu0 %v1948_v51, %s2888_s17  ;;  %v4225_v44 = vld [vmem:[#allocation19_spill] sm:$0xff] }
 0x16f   :  { %v1174_v43 = vpop.permute.xlu1 %1173  ;;  %v1167_v8 = vpop.permute.xlu0 %1166  ;;  %2445 = vrot.lane.b32.xlu1 %v4222_v61, %s2890_s21  ;;  %v1644_v51 = vcombine.high %v4225_v44, %v4224_v16  ;;  %v4226_v61 = vld [vmem:[#allocation21_spill] sm:$0xff] }
 0x170   :  { %v2231_v30 = vcombine.low %v1160_v48, %v1174_v43  ;;  %v2223_v12 = vcombine.low %v1153_v62, %v1167_v8  ;;  %v1676_v6 = vcombine.high %v4227_v52, %v4226_v61  ;;  %v2052_v62 = vcombine.high %v3572_v59, %v3569_v36 }
 0x171   :  { %v2084_v36 = vcombine.high %v3593_v13, %v3589_v39 }
 0x172   :  { %2391 = vrot.lane.b32.xlu0 %v1949_v38, %s2889_s20  ;;  %v3725_v48 = vrot.slane %v2231_v30, %v3055_v40  ;;  %v3728_v43 = vrot.slane %v2223_v12, %v3055_v40  ;;  %v2066_v38 = vrot.slane %v2052_v62, %v3076_v56 }
 0x173   :  { %v1188_v45 = vpop.permute.xlu1 %1187  ;;  %v1181_v60 = vpop.permute.xlu0 %1180  ;;  %120 = vperm.xlu1 %2855, %v3619_v5   ;;  %v1658_v5 = vrot.slane %v1644_v51, %v3076_v56  ;;  %v4248_v51 = vmov 0.0  }
 0x174   :  { %v2255_v11 = vcombine.low %v3728_v43, %v3725_v48  ;;  %v2086_v44 = vcombine.high %v2066_v38, %v2082_v1  ;;  %2790 = vmatprep.mubr.msk.bf16.mxu0 %vm2892_vm3, %v4248_v51  ;;  %33 = vst.msk [vmem:[#allocation2] sm:$0xff] %vm32_vm4, %v4248_v51  ;;  %34 = vst.msk [vmem:[#allocation2 + $0x8] sm:$0xff] %vm32_vm4, %v4248_v51 }
 0x175   :  { %v1677_v59 = vcombine.low %v1658_v5, %v1674_v24  ;;  %v1678_v9 = vcombine.high %v1658_v5, %v1674_v24  ;;  %v1796_v5 = vcombine.high %v3354_v10, %v3351_v53 }
 0x176   :  { %2455 = vrot.lane.b32.xlu0 %v1950_v32, %s2890_s21  ;;  %v3751_v12 = vrot.slane %v2255_v11, %v3076_v56  ;;  %v2188_v32 = vcombine.high %v3669_v25, %v3666_v41 }
 0x177   :  { %v1202_v23 = vpop.permute.xlu1 %1201  ;;  %v1195_v15 = vpop.permute.xlu0 %1194  ;;  %2319 = vrot.lane.b32.xlu1 %v1676_v6, %s2888_s17 }
 0x178   :  { %v2247_v57 = vcombine.low %v1188_v45, %v1202_v23  ;;  %v2239_v8 = vcombine.low %v1181_v60, %v1195_v15  ;;  %2856 = vset.pattern.permute.xlu1 %v4219_v19  ;;  %v2085_v45 = vcombine.low %v2066_v38, %v2082_v1  ;;  %v4231_v23 = vld [vmem:[#allocation26_spill] sm:$0xff] }
 0x17a   :  { %v3741_v30 = vrot.slane %v2247_v57, %v3055_v40  ;;  %v3744_v6 = vrot.slane %v2239_v8, %v3055_v40  ;;  %2331 = vrot.lane.b32.xlu0 %v2084_v36, %s2888_s17  ;;  %v2204_v40 = vcombine.high %v3685_v7, %v3682_v49  ;;  %v2202_v49 = vrot.slane %v2188_v32, %v3076_v56  ;;  %v4232_v8 = vld [vmem:[#allocation27_spill] sm:$0xff]  ;;  %v4233_v36 = vld [vmem:[#allocation28_spill] sm:$0xff] }
 0x17b   :  { %2383 = vrot.lane.b32.xlu1 %v1677_v59, %s2889_s20  ;;  %v4229_v7 = vcombine.high %v3327_v58, %v3321_v3  ;;  %v1810_v3 = vrot.slane %v1796_v5, %v3076_v56  ;;  %v1812_v59 = vcombine.high %v4233_v36, %v4232_v8  ;;  %v2000_v32 = vcombine.high %v3530_v17, %v3527_v29 }
 0x17c   :  { %v2271_v60 = vcombine.low %v3744_v6, %v3741_v30  ;;  %v2218_v62 = vrot.slane %v2204_v40, %v3076_v56  ;;  %v2016_v29 = vcombine.high %v3548_v0, %v3540_v21 }
 0x17e   :  { %v3754_v16 = vrot.slane %v2271_v60, %v3076_v56  ;;  %2395 = vrot.lane.b32.xlu0 %v2085_v45, %s2889_s20  ;;  %v2221_v24 = vcombine.low %v2202_v49, %v2218_v62  ;;  %v2222_v57 = vcombine.high %v2202_v49, %v2218_v62  ;;  %v1882_v62 = vcombine.high %v3658_v47, %v3644_v63  ;;  %v3837_v63 = vld [vmem:[%s4156_s4] ss:$0 sm:$0xff] }
 0x17f   :  { %224 = vperm.xlu1 %2856, %v3510_v22   ;;  %v2220_v22 = vcombine.high %v3703_v31, %v3699_v18  ;;  %v1984_v49 = vcombine.high %v3520_v2, %v3517_v46  ;;  %v4235_v46 = vld [vmem:[#allocation8_spill] sm:$0xff] }
 0x180   :  { %4228 = vst [vmem:[#allocation20_spill] sm:$0xff] %v3754_v16 }
 0x181   :  { %v1998_v17 = vrot.slane %v1984_v49, %v3076_v56  ;;  %v4237_v49 = vcombine.low %v3632_v27, %v3638_v4 }
 0x182   :  { %2459 = vrot.lane.b32.xlu0 %v2086_v44, %s2890_s21  ;;  %v51_v44 = vld [vmem:[%s4155_s3] sm:$0x3] }
 0x183   :  { %2447 = vrot.lane.b32.xlu1 %v1678_v9, %s2890_s21  ;;  %v3842_v47 = vrot.slane %v51_v44, %v4235_v46  ;;  %v4238_v46 = vcombine.high %v3632_v27, %v3638_v4 }
 0x184   :  { %2858 = vset.pattern.permute.xlu1 %v4218_v42  ;;  %v4230_v42 = vld [vmem:[#allocation25_spill] sm:$0xff] }
 0x185   :  { %v1780_v15 = vcombine.high %v4231_v23, %v4230_v42  ;;  %v2014_v42 = vrot.slane %v2000_v32, %v3076_v56  ;;  %v4236_v32 = vcombine.high %v3629_v34, %v3635_v14 }
 0x186   :  { %2335 = vrot.lane.b32.xlu0 %v2220_v22, %s2888_s17 }
 0x187   :  { %2449 = vrot.lane.b32.xlu1 %v4229_v7, %s2890_s21  ;;  %v1794_v53 = vrot.slane %v1780_v15, %v3076_v56 }
 0x188   :  { %v3776_v41 = vpop.permute.xlu1 %60  ;;  %v3778_v25 = vpop.permute.xlu0 %55 }
 0x189   :  { %v1814_v40 = vcombine.high %v1794_v53, %v1810_v3 }
 0x18a   :  { %2399 = vrot.lane.b32.xlu0 %v2221_v24, %s2889_s20 }
 0x18b   :  { %130 = vperm.xlu1 %2858, %v3675_v54   ;;  %v1813_v54 = vcombine.low %v1794_v53, %v1810_v3  ;;  %v2018_v53 = vcombine.high %v1998_v17, %v2014_v42 }
 0x18c   :  { %v76_v1 = vpop.permute.xlu0 %75 }
 0x18d   :  { %v3787_v58 = vpop.permute.xlu1 %176 }
 0x18e   :  { %2463 = vrot.lane.b32.xlu0 %v2222_v57, %s2890_s21 }
 0x18f   :  { %2323 = vrot.lane.b32.xlu1 %v1812_v59, %s2888_s17 }
 0x190   :  { %v3794_v10 = vpop.permute.xlu0 %2307  ;;  %2859 = vset.pattern.permute.xlu1 %v4219_v19 }
 0x192   :  { %v3797_v38 = vpop.permute.xlu1 %65 }
 0x193   :  { %2387 = vrot.lane.b32.xlu1 %v1813_v54, %s2889_s20 }
 0x194   :  { %v3800_v11 = vpop.permute.xlu0 %2371 }
 0x196   :  { %v3802_v60 = vpop.permute.xlu1 %70 }
 0x197   :  { %232 = vperm.xlu1 %2859, %v3545_v37   ;;  %v4234_v37 = vld [vmem:[#allocation7_spill] sm:$0xff] }
 0x198   :  { %v3805_v45 = vpop.permute.xlu0 %2435  ;;  %v3820_v22 = vrot.slane %v51_v44, %v4234_v37 }
 0x19a   :  { %v141_v7 = vmul.f32 %v3820_v22, %v76_v1  ;;  %v2017_v1 = vcombine.low %v1998_v17, %v2014_v42  ;;  %v2272_v42 = vcombine.high %v3744_v6, %v3741_v30  ;;  %v2256_v17 = vcombine.high %v3728_v43, %v3725_v48 }
 0x19b   :  { %2451 = vrot.lane.b32.xlu1 %v1814_v40, %s2890_s21  ;;  %v3811_v19 = vpop.permute.xlu1 %188  ;;  %v2288_v6 = vcombine.high %v3751_v12, %v3754_v16 }
 0x19c   :  { %v3813_v9 = vpop.permute.xlu0 %95  ;;  %v163_v2 = vadd.f32 %v3837_v63, %v141_v7  ;;  %v2270_v43 = vrot.slane %v2256_v17, %v3076_v56 }
 0x19f   :  { %2453 = vrot.lane.b32.xlu1 %v1882_v62, %s2890_s21 }
 0x1a0   :  { %v3826_v24 = vpop.permute.xlu1 %80  ;;  %v3828_v5 = vpop.permute.xlu0 %2313 }
 0x1a3   :  { %2329 = vrot.lane.b32.xlu1 %v2016_v29, %s2888_s17 }
 0x1a4   :  { %v3844_v23 = vpop.permute.xlu0 %2377 }
 0x1a5   :  { %v193_v15 = vpop.permute.xlu1 %192 }
 0x1a6   :  { %v247_v57 = vmul.f32 %v3842_v47, %v193_v15 }
 0x1a7   :  { %2393 = vrot.lane.b32.xlu1 %v2017_v1, %s2889_s20  ;;  %v2286_v1 = vrot.slane %v2272_v42, %v3076_v56 }
 0x1a8   :  { %v3848_v3 = vadd.f32 %v247_v57, %v163_v2  ;;  %v3850_v59 = vpop.permute.xlu0 %105  ;;  %v4239_v57 = vld [vmem:[#allocation24_spill] sm:$0xff] }
 0x1a9   :  { %v2290_v17 = vcombine.high %v2270_v43, %v2286_v1 }
 0x1aa   :  { %v3852_v54 = vpop.permute.xlu1 %85 }
 0x1ab   :  { %2457 = vrot.lane.b32.xlu1 %v2018_v53, %s2890_s21  ;;  %v4240_v53 = vld [vmem:[#allocation23_spill] sm:$0xff] }
 0x1ac   :  { %v3855_v40 = vpop.permute.xlu0 %2317 }
 0x1ae   :  { %v91_v44 = vpop.permute.xlu1 %90 }
 0x1af   :  { %2333 = vrot.lane.b32.xlu1 %v4236_v32, %s2888_s17  ;;  %v144_v2 = vmul.f32 %v3820_v22, %v91_v44  ;;  %v4241_v32 = vcombine.low %v4239_v57, %v4240_v53 }
 0x1b0   :  { %v3861_v62 = vpop.permute.xlu0 %2381 }
 0x1b1   :  { %v166_v44 = vadd.f32 %v3837_v63, %v144_v2  ;;  %v138_v2 = vmul.f32 %v3820_v22, %v3776_v41  ;;  %v4243_v41 = vld [vmem:[#allocation9_spill] sm:$0xff] }
 0x1b2   :  { %v2310_v37 = vpop.permute.xlu1 %2309 }
 0x1b3   :  { %2397 = vrot.lane.b32.xlu1 %v4237_v49, %s2889_s20 }
 0x1b4   :  { %v3867_v7 = vpop.permute.xlu0 %115 }
 0x1b6   :  { %v2374_v29 = vpop.permute.xlu1 %2373 }
 0x1b7   :  { %2461 = vrot.lane.b32.xlu1 %v4238_v46, %s2890_s21  ;;  %v2289_v46 = vcombine.low %v2270_v43, %v2286_v1  ;;  %v4242_v43 = vld [vmem:[#allocation10_spill] sm:$0xff] }
 0x1b8   :  { %v2322_v15 = vpop.permute.xlu0 %2321 }
 0x1b9   :  { %v2491_v30 = vsel %vm2483_vm0, %v4241_v32, %v2322_v15  ;;  %v137_v15 = vmul.f32 %v3820_v22, %v3778_v25  ;;  %v243_v32 = vmul.f32 %v3842_v47, %v3787_v58  ;;  %v160_v25 = vadd.f32 %v3837_v63, %v138_v2  ;;  %v4246_v2 = vld [vmem:[#allocation11_spill] sm:$0xff] }
 0x1ba   :  { %v205_v48 = vpop.permute.xlu1 %204 }
 0x1bb   :  { %v250_v27 = vmul.f32 %v3842_v47, %v205_v48  ;;  %2337 = vrot.lane.b32.xlu1 %v2288_v6, %s2888_s17  ;;  %v159_v53 = vadd.f32 %v3837_v63, %v137_v15 }
 0x1bc   :  { %v2386_v4 = vpop.permute.xlu0 %2385 }
 0x1bd   :  { %v3889_v49 = vadd.f32 %v250_v27, %v166_v44  ;;  %v3892_v42 = vsel %vm2500_vm1, %v2491_v30, %v2386_v4  ;;  %v259_v48 = vadd.f32 %v243_v32, %v159_v53  ;;  %v4244_v27 = vcombine.low %v4242_v43, %v4243_v41 }
 0x1be   :  { %v2438_v57 = vpop.permute.xlu1 %2437 }
 0x1bf   :  { %2401 = vrot.lane.b32.xlu1 %v2289_v46, %s2889_s20  ;;  %v2484_v4 = vsel %vm2483_vm0, %v4244_v27, %v3794_v10  ;;  %v275_v16 = vmax.f32 %v259_v48, 0.0  ;;  %v2631_v48 = vld [vmem:[%s4157_s5 + $0x8] sm:$0xff] }
 0x1c0   :  { %v3897_v56 = vpop.permute.xlu0 %125  ;;  %v2501_v58 = vsel %vm2500_vm1, %v2484_v4, %v3800_v11  ;;  %v139_v11 = vmul.f32 %v3820_v22, %v3797_v38 }
 0x1c1   :  { %v2518_v15 = vsel %vm2517_vm2, %v2501_v58, %v3805_v45  ;;  %v145_v45 = vmul.f32 %v3820_v22, %v3813_v9 }
 0x1c2   :  { %v3904_v30 = vpop.permute.xlu1 %100 }
 0x1c3   :  { %2465 = vrot.lane.b32.xlu1 %v2290_v17, %s2890_s21  ;;  %v4245_v17 = vld [vmem:[#allocation12_spill] sm:$0xff] }
 0x1c4   :  { %v4247_v53 = vcombine.low %v4245_v17, %v4246_v2 }
 0x1c5   :  { %v181_v6 = vpop.permute.xlu0 %180 }
 0x1c6   :  { %v244_v44 = vmul.f32 %v3842_v47, %v181_v6  ;;  %v2312_v1 = vpop.permute.xlu1 %2311  ;;  %v2485_v32 = vsel %vm2483_vm0, %v4247_v53, %v2310_v37  ;;  %v2630_v37 = vld [vmem:[%s4157_s5] sm:$0xff] }
 0x1c7   :  { %v2502_v43 = vsel %vm2500_vm1, %v2485_v32, %v2374_v29  ;;  %v140_v29 = vmul.f32 %v3820_v22, %v3802_v60  ;;  %v2813_v38 = vpack.c.bf16 %v2631_v48, %v2630_v37  ;;  %v167_v60 = vadd.f32 %v3837_v63, %v145_v45  ;;  %v4252_v37 = vld [vmem:[#allocation14_spill] sm:$0xff] }
 0x1c8   :  { %v260_v46 = vadd.f32 %v244_v44, %v160_v25  ;;  %v2519_v25 = vsel %vm2517_vm2, %v2502_v43, %v2438_v57  ;;  %v2534_v44 = vmul.f32 %v2518_v15, %v275_v16  ;;  %v246_v57 = vmul.f32 %v3842_v47, %v3811_v19  ;;  %v4249_v43 = vld [vmem:[#allocation13_spill] sm:$0xff] }
 0x1c9   :  { %v185_v6 = vpop.permute.xlu0 %184  ;;  %2814 = vmatprep.subr.bf16.mxu1 %v2813_v38  ;;  %v161_v15 = vadd.f32 %v3837_v63, %v139_v11  ;;  %v162_v17 = vadd.f32 %v3837_v63, %v140_v29  ;;  %v4251_v11 = vld [vmem:[#allocation15_spill] sm:$0xff] }
 0x1ca   :  { %v276_v10 = vmax.f32 %v260_v46, 0.0  ;;  %v2376_v41 = vpop.permute.xlu1 %2375  ;;  %v245_v4 = vmul.f32 %v3842_v47, %v185_v6  ;;  %2816 = vmatpush3.bf16.msra.mxu1 %v2813_v38  ;;  %v4253_v48 = vcombine.low %v4251_v11, %v4252_v37  ;;  %v279_v37 = vmax.f32 %v3848_v3, 0.0 }
 0x1cb   :  { %v262_v19 = vadd.f32 %v246_v57, %v162_v17 }
 0x1cc   :  { %v2535_v27 = vmul.f32 %v2519_v25, %v276_v10  ;;  %v261_v32 = vadd.f32 %v245_v4, %v161_v15  ;;  %v4250_v10 = vcombine.low %v3158_v26, %v4249_v43  ;;  %v2487_v29 = vsel %vm2483_vm0, %v4253_v48, %v3828_v5 }
 0x1cd   :  { %v197_v9 = vpop.permute.xlu0 %196  ;;  %v278_v38 = vmax.f32 %v262_v19, 0.0  ;;  %v2504_v57 = vsel %vm2500_vm1, %v2487_v29, %v3844_v23  ;;  %v142_v19 = vmul.f32 %v3820_v22, %v3826_v24 }
 0x1ce   :  { %v209_v58 = vpop.permute.xlu1 %208  ;;  %v2550_v46 = vpack.c.bf16 %v2535_v27, %v2534_v44  ;;  %v2486_v45 = vsel %vm2483_vm0, %v4250_v10, %v2312_v1  ;;  %v277_v4 = vmax.f32 %v261_v32, 0.0 }
 0x1cf   :  { %v251_v16 = vmul.f32 %v3842_v47, %v209_v58  ;;  %v2503_v25 = vsel %vm2500_vm1, %v2486_v45, %v2376_v41  ;;  %v164_v10 = vadd.f32 %v3837_v63, %v142_v19  ;;  %v4254_v45 = vcombine.low %v3228_v35, %v3225_v28 }
 0x1d0   :  { %2775 = vmatpush3.bf16.msra.mxu0 %v2550_v46 }
 0x1d1   :  { %v3948_v2 = vadd.f32 %v251_v16, %v167_v60  ;;  %v3950_v53 = vpop.permute.xlu0 %200  ;;  %2776 = vmatprep.subr.bf16.mxu0 %v4248_v51 }
 0x1d2   :  { %v2440_v6 = vpop.permute.xlu1 %2439 }
 0x1d3   :  { %v2520_v44 = vsel %vm2517_vm2, %v2503_v25, %v2440_v6  ;;  %v248_v6 = vmul.f32 %v3842_v47, %v197_v9 }
 0x1d4   :  { %v2536_v58 = vmul.f32 %v2520_v44, %v277_v4  ;;  %v147_v44 = vmul.f32 %v3820_v22, %v3850_v59  ;;  %v4256_v4 = vld [vmem:[#allocation17_spill] sm:$0xff] }
 0x1d5   :  { %v3964_v27 = vpop.permute.xlu0 %212  ;;  %v264_v48 = vadd.f32 %v248_v6, %v164_v10 }
 0x1d6   :  { %v2442_v26 = vpop.permute.xlu1 %2441 }
 0x1d7   :  { %v2521_v1 = vsel %vm2517_vm2, %v2504_v57, %v2442_v26  ;;  %v4255_v57 = vld [vmem:[#allocation16_spill] sm:$0xff] }
 0x1d8   :  { %v2537_v41 = vmul.f32 %v2521_v1, %v278_v38  ;;  %v4257_v28 = vcombine.low %v4255_v57, %v4256_v4 }
 0x1d9   :  { %v3969_v46 = vpop.permute.xlu0 %220 }
 0x1da   :  { %v3971_v60 = vpop.permute.xlu1 %110  ;;  %v2551_v16 = vpack.c.bf16 %v2537_v41, %v2536_v58  ;;  %v2489_v35 = vsel %vm2483_vm0, %v4257_v28, %v3855_v40  ;;  %v280_v58 = vmax.f32 %v264_v48, 0.0  ;;  %v4258_v40 = vcombine.low %v3496_v55, %v3491_v20 }
 0x1db   :  { %v2506_v3 = vsel %vm2500_vm1, %v2489_v35, %v3861_v62  ;;  %v249_v20 = vmul.f32 %v3842_v47, %v3950_v53 }
 0x1dc   :  { %2777 = vmatpush3.bf16.msra.mxu0 %v2551_v16  ;;  %v169_v16 = vadd.f32 %v3837_v63, %v147_v44 }
 0x1dd   :  { %v3973_v5 = vpop.permute.xlu0 %228  ;;  %2778 = vmatprep.subr.bf16.mxu0 %v4248_v51 }
 0x1de   :  { %v2316_v15 = vpop.permute.xlu1 %2315 }
 0x1df   :  { %v2488_v25 = vsel %vm2483_vm0, %v4254_v45, %v2316_v15 }
 0x1e1   :  { %v3976_v17 = vpop.permute.xlu0 %2325 }
 0x1e2   :  { %v2380_v23 = vpop.permute.xlu1 %2379 }
 0x1e3   :  { %v2505_v29 = vsel %vm2500_vm1, %v2488_v25, %v2380_v23 }
 0x1e5   :  { %v3980_v32 = vpop.permute.xlu0 %2389 }
 0x1e6   :  { %v217_v43 = vpop.permute.xlu1 %216 }
 0x1e7   :  { %v253_v26 = vmul.f32 %v3842_v47, %v217_v43 }
 0x1e9   :  { %v3988_v11 = vpop.permute.xlu0 %236  ;;  %v269_v23 = vadd.f32 %v253_v26, %v169_v16 }
 0x1ea   :  { %v2444_v24 = vpop.permute.xlu1 %2443 }
 0x1eb   :  { %v2522_v9 = vsel %vm2517_vm2, %v2505_v29, %v2444_v24  ;;  %v285_v45 = vmax.f32 %v269_v23, 0.0  ;;  %v143_v24 = vmul.f32 %v3820_v22, %v3852_v54  ;;  %v4259_v54 = vcombine.low %v4227_v52, %v4226_v61 }
 0x1ec   :  { %v2538_v38 = vmul.f32 %v2522_v9, %v279_v37  ;;  %v149_v9 = vmul.f32 %v3820_v22, %v3867_v7  ;;  %v4260_v7 = vcombine.low %v3593_v13, %v3589_v39 }
 0x1ed   :  { %v2328_v1 = vpop.permute.xlu0 %2327 }
 0x1ee   :  { %v2446_v41 = vpop.permute.xlu1 %2445  ;;  %v2494_v43 = vsel %vm2483_vm0, %v4258_v40, %v2328_v1  ;;  %v171_v35 = vadd.f32 %v3837_v63, %v149_v9  ;;  %v282_v40 = vmax.f32 %v3889_v49, 0.0  ;;  %v146_v49 = vmul.f32 %v3820_v22, %v3904_v30 }
 0x1ef   :  { %v2523_v59 = vsel %vm2517_vm2, %v2506_v3, %v2446_v41 }
 0x1f0   :  { %v2539_v15 = vmul.f32 %v2523_v59, %v280_v58 }
 0x1f1   :  { %v2392_v19 = vpop.permute.xlu0 %2391 }
 0x1f2   :  { %v4005_v6 = vpop.permute.xlu1 %120  ;;  %v2552_v10 = vpack.c.bf16 %v2539_v15, %v2538_v38  ;;  %v2511_v62 = vsel %vm2500_vm1, %v2494_v43, %v2392_v19  ;;  %v165_v38 = vadd.f32 %v3837_v63, %v143_v24  ;;  %v151_v24 = vmul.f32 %v3820_v22, %v3897_v56 }
 0x1f4   :  { %2779 = vmatpush3.bf16.msra.mxu0 %v2552_v10  ;;  %v265_v4 = vadd.f32 %v249_v20, %v165_v38  ;;  %v252_v20 = vmul.f32 %v3842_v47, %v3964_v27  ;;  %v168_v38 = vadd.f32 %v3837_v63, %v146_v49  ;;  %v4262_v27 = vcombine.low %v3703_v31, %v3699_v18 }
 0x1f5   :  { %v2456_v25 = vpop.permute.xlu0 %2455  ;;  %2780 = vmatprep.subr.bf16.mxu0 %v4248_v51 }
 0x1f6   :  { %v2528_v37 = vsel %vm2517_vm2, %v2511_v62, %v2456_v25  ;;  %v2320_v48 = vpop.permute.xlu1 %2319  ;;  %v281_v58 = vmax.f32 %v265_v4, 0.0  ;;  %v4261_v4 = vcombine.low %v4233_v36, %v4232_v8  ;;  %v268_v30 = vadd.f32 %v252_v20, %v168_v38 }
 0x1f7   :  { %v4014_v29 = vmul.f32 %v2528_v37, %v285_v45  ;;  %v2490_v1 = vsel %vm2483_vm0, %v4259_v54, %v2320_v48 }
 0x1f8   :  { %v284_v31 = vmax.f32 %v268_v30, 0.0 }
 0x1f9   :  { %v2332_v44 = vpop.permute.xlu0 %2331 }
 0x1fa   :  { %v2384_v55 = vpop.permute.xlu1 %2383  ;;  %v2496_v41 = vsel %vm2483_vm0, %v4260_v7, %v2332_v44 }
 0x1fb   :  { %v2507_v16 = vsel %vm2500_vm1, %v2490_v1, %v2384_v55  ;;  %v173_v55 = vadd.f32 %v3837_v63, %v151_v24  ;;  %v4265_v24 = vcombine.low %v3629_v34, %v3635_v14 }
 0x1fd   :  { %v2396_v57 = vpop.permute.xlu0 %2395 }
 0x1fe   :  { %v225_v28 = vpop.permute.xlu1 %224  ;;  %v2513_v15 = vsel %vm2500_vm1, %v2496_v41, %v2396_v57  ;;  %v148_v41 = vmul.f32 %v3820_v22, %v3971_v60  ;;  %v4264_v60 = vcombine.low %v3548_v0, %v3540_v21 }
 0x1ff   :  { %v255_v26 = vmul.f32 %v3842_v47, %v225_v28 }
 0x201   :  { %v271_v3 = vadd.f32 %v255_v26, %v171_v35  ;;  %v2460_v53 = vpop.permute.xlu0 %2459  ;;  %v283_v35 = vmax.f32 %v3948_v2, 0.0  ;;  %v4263_v2 = vcombine.low %v3435_v33, %v3424_v50 }
 0x202   :  { %v2448_v59 = vpop.permute.xlu1 %2447  ;;  %v2530_v61 = vsel %vm2517_vm2, %v2513_v15, %v2460_v53 }
 0x203   :  { %v287_v23 = vmax.f32 %v271_v3, 0.0  ;;  %v2524_v19 = vsel %vm2517_vm2, %v2507_v16, %v2448_v59  ;;  %v2493_v7 = vsel %vm2483_vm0, %v4263_v2, %v3976_v17 }
 0x204   :  { %v2540_v52 = vmul.f32 %v2524_v19, %v281_v58  ;;  %v2510_v16 = vsel %vm2500_vm1, %v2493_v7, %v3980_v32  ;;  %v254_v19 = vmul.f32 %v3842_v47, %v3969_v46  ;;  %v2577_v7 = vld [vmem:[#allocation2] sm:$0xff] }
 0x205   :  { %v4037_v10 = vmul.f32 %v2530_v61, %v287_v23  ;;  %v2336_v25 = vpop.permute.xlu0 %2335  ;;  %v170_v61 = vadd.f32 %v3837_v63, %v148_v41 }
 0x206   :  { %v2450_v43 = vpop.permute.xlu1 %2449  ;;  %v2498_v26 = vsel %vm2483_vm0, %v4262_v27, %v2336_v25  ;;  %v256_v25 = vmul.f32 %v3842_v47, %v3973_v5 }
 0x207   :  { %v2525_v39 = vsel %vm2517_vm2, %v3892_v42, %v2450_v43  ;;  %v270_v17 = vadd.f32 %v254_v19, %v170_v61 }
 0x208   :  { %v2541_v13 = vmul.f32 %v2525_v39, %v282_v40  ;;  %v150_v40 = vmul.f32 %v3820_v22, %v4005_v6 }
 0x209   :  { %v2400_v44 = vpop.permute.xlu0 %2399  ;;  %v286_v39 = vmax.f32 %v270_v17, 0.0 }
 0x20a   :  { %v131_v45 = vpop.permute.xlu1 %130  ;;  %v2553_v62 = vpack.c.bf16 %v2541_v13, %v2540_v52  ;;  %v2515_v3 = vsel %vm2500_vm1, %v2498_v26, %v2400_v44  ;;  %v2632_v26 = vld [vmem:[%s4157_s5 + $0x10] sm:$0xff] }
 0x20b   :  { %v152_v49 = vmul.f32 %v3820_v22, %v131_v45  ;;  %v4266_v22 = vld [vmem:[#allocation20_spill] sm:$0xff] }
 0x20c   :  { %2781 = vmatpush3.bf16.msra.mxu0 %v2553_v62  ;;  %v4267_v45 = vcombine.low %v3751_v12, %v4266_v22  ;;  %v2893_v12 = vmov 1.0|1.0  }
 0x20d   :  { %2782 = vmatprep.subr.bf16.mxu0 %v4248_v51  ;;  %v2464_v57 = vpop.permute.xlu0 %2463 }
 0x20e   :  { %v2324_v37 = vpop.permute.xlu1 %2323  ;;  %v2532_v8 = vsel %vm2517_vm2, %v2515_v3, %v2464_v57  ;;  %v2634_v3 = vld [vmem:[%s4157_s5 + $0x20] sm:$0xff] }
 0x20f   :  { %v2492_v56 = vsel %vm2483_vm0, %v4261_v4, %v2324_v37  ;;  %v172_v37 = vadd.f32 %v3837_v63, %v150_v40  ;;  %v258_v4 = vmul.f32 %v3842_v47, %v3988_v11 }
 0x211   :  { %v272_v0 = vadd.f32 %v256_v25, %v172_v37 }
 0x212   :  { %v2388_v48 = vpop.permute.xlu1 %2387 }
 0x213   :  { %v2509_v54 = vsel %vm2500_vm1, %v2492_v56, %v2388_v48 }
 0x216   :  { %v233_v42 = vpop.permute.xlu1 %232 }
 0x217   :  { %v257_v9 = vmul.f32 %v3842_v47, %v233_v42  ;;  %v288_v42 = vmax.f32 %v272_v0, 0.0  ;;  %v2747_v47 = vld [vmem:[%s4154_s2] ss:$0 sm:$0xff] }
 0x219   :  { %v273_v28 = vadd.f32 %v257_v9, %v173_v55 }
 0x21a   :  { %v2452_v1 = vpop.permute.xlu1 %2451 }
 0x21b   :  { %v289_v53 = vmax.f32 %v273_v28, 0.0  ;;  %v2526_v58 = vsel %vm2517_vm2, %v2509_v54, %v2452_v1  ;;  %v4268_v28 = vld [vmem:[#allocation6_spill] sm:$0xff]  ;;  %v2633_v54 = vld [vmem:[%s4157_s5 + $0x18] sm:$0xff] }
 0x21c   :  { %v2542_v36 = vmul.f32 %v2526_v58, %v283_v35  ;;  %v2560_v35 = vadd.s32 8, %v4268_v28  ;;  %vm2570_vm5 = vcmp.eq.s32.totalorder %v4268_v28, %v2747_v47  ;;  %v2817_v1 = vpack.c.bf16 %v2633_v54, %v2632_v26 }
 0x21d   :  { %v2548_v18 = vmul.f32 %v2532_v8, %v289_v53  ;;  %v2635_v53 = vld [vmem:[%s4157_s5 + $0x28] sm:$0xff]  ;;  %v2636_v8 = vld [vmem:[%s4157_s5 + $0x30] sm:$0xff] }
 0x21e   :  { %v2454_v59 = vpop.permute.xlu1 %2453  ;;  %vm2571_vm6 = vcmp.eq.s32.totalorder %v2560_v35, %v2747_v47  ;;  %2818 = vmatprep.subr.bf16.mxu1 %v2817_v1  ;;  %v2821_v58 = vpack.c.bf16 %v2635_v53, %v2634_v3 }
 0x21f   :  { %v2527_v15 = vsel %vm2517_vm2, %v2510_v16, %v2454_v59  ;;  %vm2750_vm7 = vmpackc.low %vm2571_vm6, %vm2570_vm5  ;;  %2820 = vmatpush3.bf16.msra.mxu1 %v2817_v1 }
 0x220   :  { %v2543_v23 = vmul.f32 %v2527_v15, %v284_v31  ;;  %2822 = vmatprep.subr.bf16.mxu1 %v2821_v58  ;;  %v2578_v31 = vld [vmem:[#allocation2 + $0x8] sm:$0xff] }
 0x222   :  { %v2330_v50 = vpop.permute.xlu1 %2329  ;;  %v2554_v33 = vpack.c.bf16 %v2543_v23, %v2542_v36  ;;  %v2637_v36 = vld [vmem:[%s4157_s5 + $0x38] sm:$0xff] }
 0x223   :  { %v2495_v32 = vsel %vm2483_vm0, %v4264_v60, %v2330_v50  ;;  %v2825_v2 = vpack.c.bf16 %v2637_v36, %v2636_v8  ;;  %2824 = vmatpush3.bf16.msra.mxu1 %v2821_v58  ;;  %v2752_v50 = vld [vmem:[%s4158_s6] ss:$0 sm:$0xff] }
 0x224   :  { %2783 = vmatpush3.bf16.msra.mxu0 %v2554_v33 }
 0x225   :  { %2784 = vmatprep.subr.bf16.mxu0 %v4248_v51  ;;  %2826 = vmatprep.subr.bf16.mxu1 %v2825_v2 }
 0x226   :  { %v2394_v52 = vpop.permute.xlu1 %2393 }
 0x227   :  { %v2512_v43 = vsel %vm2500_vm1, %v2495_v32, %v2394_v52  ;;  %2828 = vmatpush3.bf16.msra.mxu1 %v2825_v2 }
 0x22a   :  { %v2458_v46 = vpop.permute.xlu1 %2457 }
 0x22b   :  { %v2529_v13 = vsel %vm2517_vm2, %v2512_v43, %v2458_v46 }
 0x22c   :  { %v2545_v62 = vmul.f32 %v2529_v13, %v286_v39 }
 0x22e   :  { %v2334_v48 = vpop.permute.xlu1 %2333  ;;  %v2555_v21 = vpack.c.bf16 %v2545_v62, %v4014_v29  ;;  %v174_v29 = vadd.f32 %v3837_v63, %v152_v49 }
 0x22f   :  { %v2497_v44 = vsel %vm2483_vm0, %v4265_v24, %v2334_v48 }
 0x230   :  { %2785 = vmatpush3.bf16.msra.mxu0 %v2555_v21  ;;  %v274_v34 = vadd.f32 %v258_v4, %v174_v29 }
 0x231   :  { %2786 = vmatprep.subr.bf16.mxu0 %v4248_v51 }
 0x232   :  { %v2398_v6 = vpop.permute.xlu1 %2397  ;;  %v290_v27 = vmax.f32 %v274_v34, 0.0 }
 0x233   :  { %v2514_v20 = vsel %vm2500_vm1, %v2497_v44, %v2398_v6 }
 0x236   :  { %v2462_v5 = vpop.permute.xlu1 %2461 }
 0x237   :  { %v2531_v55 = vsel %vm2517_vm2, %v2514_v20, %v2462_v5 }
 0x238   :  { %v2547_v9 = vmul.f32 %v2531_v55, %v288_v42 }
 0x23a   :  { %v2338_v38 = vpop.permute.xlu1 %2337  ;;  %v2556_v57 = vpack.c.bf16 %v2547_v9, %v4037_v10 }
 0x23b   :  { %v2499_v56 = vsel %vm2483_vm0, %v4267_v45, %v2338_v38 }
 0x23c   :  { %2787 = vmatpush3.bf16.msra.mxu0 %v2556_v57 }
 0x23d   :  { %2788 = vmatprep.subr.bf16.mxu0 %v4248_v51 }
 0x23e   :  { %v2402_v14 = vpop.permute.xlu1 %2401 }
 0x23f   :  { %v2516_v63 = vsel %vm2500_vm1, %v2499_v56, %v2402_v14 }
 0x242   :  { %v2466_v30 = vpop.permute.xlu1 %2465 }
 0x243   :  { %v2533_v11 = vsel %vm2517_vm2, %v2516_v63, %v2466_v30 }
 0x244   :  { %v2549_v51 = vmul.f32 %v2533_v11, %v290_v27 }
 0x246   :  { %v2557_v10 = vpack.c.bf16 %v2549_v51, %v2548_v18 }
 0x248   :  { %2789 = vmatpush3.bf16.msra.mxu0 %v2557_v10 }
 0x24b   :  { %2791 = vmatmul.mubr.msk.bf16.vlgmr.msra.gmra.mrb[0].mxu0 %vm2750_vm7, %v2893_v12 }
 0x31e   :  { %v2613_v18 = vpop.f32.mrb[0].mxu0 }
 0x31f   :  { %v2620_v41 = vadd.f32 %v2613_v18, %v2577_v7  ;;  %v2792_v16 = vpop.f32.mrb[1].mxu0 }
 0x320   :  { %v2616_v59 = vpop.f32.mrb[2].mxu0 }
 0x321   :  { %2623 = vst.msk [vmem:[#allocation2] sm:$0xff] %vm32_vm4, %v2620_v41  ;;  %v2621_v15 = vadd.f32 %v2616_v59, %v2578_v31  ;;  %v2793_v23 = vpop.f32.mrb[3].mxu0 }
 0x323   :  { %2624 = vst.msk [vmem:[#allocation2 + $0x8] sm:$0xff] %vm32_vm4, %v2621_v15 }
 0x328   :  { %v2628_v19 = vld [vmem:[#allocation2] sm:$0xff] }
 0x329   :  { %2810 = vmatprep.mubr.msk.f32.mxu1 %vm32_vm4, %v2628_v19 }
 0x32a   :  { %v2629_v61 = vld [vmem:[#allocation2 + $0x8] sm:$0xff] }
 0x32b   :  { %2811 = vmatmul.mubr.msk.f32.vlgmr.msra.gmra.mrb[0].mxu1 %vm32_vm4, %v2629_v61 }
 0x3fe   :  { %v2812_v33 = vpop.f32.mrb[0].mxu1 }
 0x3ff   :  { %v2723_v17 = vadd.f32 %v2812_v33, %v2752_v50  ;;  %v2717_v52 = vpop.f32.mrb[1].mxu1 }
 0x400   :  { %v2718_v60 = vadd.f32 %v2752_v50, %v2717_v52 }
 0x401   :  { %v2727_v32 = vmax.f32 %v2723_v17, 0.0 }
 0x402   :  { %v2726_v40 = vmax.f32 %v2718_v60, 0.0 }
 0x403   :  { %2729 = vst [vmem:[#allocation3 + $0x8] sm:$0xff] %v2727_v32 }
 0x404   :  { %2728 = vst [vmem:[#allocation3] sm:$0xff] %v2726_v40 }
 0x405   :  { %2871 = shalt.err (!%p2868_p4)
}
 0x406   :  { %s2872_s22 = scalar_lea.hbm %s4159_s7, 256 }
 0x407   :  { %p2873_p5 = scmp.ne.s32.totalorder %s4159_s7, %s2872_s22  ;;  %p2876_p6 = scmp.lt.u32.totalorder %s2872_s22, %s4159_s7 }
 0x409   :  { %p2878_p7 = pnand %p2876_p6, %p2873_p5 }
 0x40b   :  { %2881 = shalt.err (!%p2878_p7)
}
 0x40c   :  { %s2895_s4 = smov 128   ;;  %s2896_s17 = smov 8  }
 0x40d   :  { %2741 = dma.vmem_to_hbm [thread:$0]  %s2736_s16, 256, %s4159_s7, [#allocation4], %s2895_s4, %s2895_s4, %s2896_s17  }
 0x40e   :  { %2882 = dma.done.wait [#allocation4], 256  }
 0x40f   :  { %2883 = vsyncadd [#allocation4], 4294967040 }
 0x410   :  { %2745 = vsyncpa [#allocation4], 1 }

</bundles_post_ra>
